<compile_context>
chip_gen: v5e
topology: v5e:2x2
jax: 0.10.0
libtpu: 0.0.40
codegen_flags: <defaults>
</compile_context>

<pallas_src>
import functools

import jax
import jax.numpy as jnp
from jax.experimental import pallas as pl
from jax.experimental.pallas import tpu as pltpu


def _basic_conv_kernel(x_ref, w_ref, b_ref, o_ref, xpad_ref, *,
                       in_h, in_w, out_h, out_w, kh, kw, cin, cout, pad):
    """One batch element per grid step.

    x_ref:    (1, Cin, H, W)        raw (unpadded) NCHW input block
    w_ref:    (Cout, KH*KW*Cin)     BN-scale-folded weights (compute dtype)
    b_ref:    (Cout, 1)             folded BN bias (f32)
    o_ref:    (1, Cout, OH*OW)      lane-dense output (f32)
    xpad_ref: (Cin, H+2p, W+2p)     f32 VMEM scratch, zero halo fused here
    """
    # Fused zero-padding: zero the scratch, copy the input into the interior.
    xpad_ref[...] = jnp.zeros_like(xpad_ref)
    xpad_ref[:, pad:pad + in_h, pad:pad + in_w] = x_ref[0].astype(xpad_ref.dtype)

    # im2col: build the (KH*KW*Cin, OH*OW) patch matrix once (tap-major rows,
    # channel-minor within each tap — matches the wrapper's weight layout).
    m = out_h * out_w
    taps = []
    for i in range(kh):          # static Python loops -> fully unrolled slices
        for j in range(kw):
            taps.append(xpad_ref[:, i:i + out_h, j:j + out_w].reshape(cin, m))
    patches = jnp.concatenate(taps, axis=0).astype(w_ref.dtype)

    # ONE MXU matmul with K = KH*KW*Cin, f32 accumulation, lane-dense (Cout, M).
    acc = jnp.dot(w_ref[...], patches, preferred_element_type=jnp.float32)

    # Epilogue (f32): BN scale already folded into w -> just bias + ReLU.
    y = jnp.maximum(acc + b_ref[...], 0.0)
    o_ref[0] = y.astype(o_ref.dtype)


def basic_conv(x_nchw, weight, gamma, beta, running_mean, running_var, *,
               stride=1, padding=0, dilation=1, groups=1, eps=1e-5,
               compute_dtype=jnp.float32):
    """BasicConv forward: Conv2d(bias=False) -> BatchNorm2d(eval) -> ReLU.

    x_nchw: (N, Cin, H, W); weight: (Cout, Cin, KH, KW). Returns NCHW f32.
    compute_dtype: matmul-operand dtype. Use jnp.bfloat16 on v6e/v7x (native
    MXU path, half the DMA bytes); accumulation and epilogue stay f32.
    """
    assert stride == 1 and dilation == 1 and groups == 1, (
        "only stride=1, dilation=1, groups=1 is implemented (triplet-attention use)")
    n, cin, h, w = x_nchw.shape
    cout, cin_w, kh, kw = weight.shape
    assert cin_w == cin
    out_h = h + 2 * padding - kh + 1
    out_w = w + 2 * padding - kw + 1
    assert out_h > 0 and out_w > 0

    # Fold eval-mode BatchNorm: scale into the weights, bias kept separate (f32).
    inv_std = 1.0 / jnp.sqrt(running_var.astype(jnp.float32) + eps)
    scale = gamma.astype(jnp.float32) * inv_std                                 # (Cout,)
    bias = (beta.astype(jnp.float32)
            - gamma.astype(jnp.float32) * running_mean.astype(jnp.float32) * inv_std
            ).reshape(cout, 1)

    # (Cout, Cin, KH, KW) -> (Cout, KH*KW*Cin), tap-major / channel-minor columns.
    w_folded = weight.astype(jnp.float32) * scale[:, None, None, None]
    w_mat = jnp.transpose(w_folded, (0, 2, 3, 1)).reshape(cout, kh * kw * cin)

    kernel = functools.partial(
        _basic_conv_kernel, in_h=h, in_w=w, out_h=out_h, out_w=out_w,
        kh=kh, kw=kw, cin=cin, cout=cout, pad=padding)

    out_flat = pl.pallas_call(
        kernel,
        out_shape=jax.ShapeDtypeStruct((n, cout, out_h * out_w), jnp.float32),
        grid_spec=pltpu.PrefetchScalarGridSpec(
            num_scalar_prefetch=0,
            grid=(n,),
            in_specs=[
                pl.BlockSpec((1, cin, h, w), lambda b: (b, 0, 0, 0)),
                pl.BlockSpec((cout, kh * kw * cin), lambda b: (0, 0)),
                pl.BlockSpec((cout, 1), lambda b: (0, 0)),
            ],
            out_specs=pl.BlockSpec((1, cout, out_h * out_w), lambda b: (b, 0, 0)),
            scratch_shapes=[
                pltpu.VMEM((cin, h + 2 * padding, w + 2 * padding), jnp.float32),
            ],
        ),
        compiler_params=pltpu.CompilerParams(
            dimension_semantics=("parallel",)),  # keeps both v7x TCs busy (N>=2)
    )(x_nchw.astype(compute_dtype), w_mat.astype(compute_dtype), bias)

    # (N, Cout, OH*OW) -> (N, Cout, OH, OW): pure reshape, no transpose.
    return out_flat.reshape(n, cout, out_h, out_w)


def _reference(x, weight, gamma, beta, mean, var, *, padding, eps=1e-5,
               compute_dtype=jnp.float32):
    """Pure-JAX reference mirroring the kernel's operand quantization."""
    inv_std = 1.0 / jnp.sqrt(var.astype(jnp.float32) + eps)
    scale = gamma.astype(jnp.float32) * inv_std
    bias = (beta.astype(jnp.float32)
            - gamma.astype(jnp.float32) * mean.astype(jnp.float32) * inv_std)
    w_folded = weight.astype(jnp.float32) * scale[:, None, None, None]
    xq = x.astype(compute_dtype).astype(jnp.float32)
    wq = w_folded.astype(compute_dtype).astype(jnp.float32)
    y = jax.lax.conv_general_dilated(
        xq, wq, window_strides=(1, 1),
        padding=[(padding, padding), (padding, padding)],
        dimension_numbers=("NCHW", "OIHW", "NCHW"),
        precision=jax.lax.Precision.HIGHEST)
    y = y + bias[None, :, None, None]
    return jnp.maximum(y, 0.0)


if __name__ == "__main__":
    # BasicConv(in_planes=4, out_planes=8, kernel_size=3, padding=1)
    N, CIN, H, W = 2, 4, 16, 16
    COUT, KH, KW = 8, 3, 3
    PAD = 1

    key = jax.random.PRNGKey(0)
    k_x, k_w, k_g, k_b, k_m, k_v = jax.random.split(key, 6)

    x = jax.random.normal(k_x, (N, CIN, H, W), dtype=jnp.float32)
    fan_in = CIN * KH * KW
    weight = jax.random.uniform(k_w, (COUT, CIN, KH, KW), dtype=jnp.float32,
                                minval=-1.0, maxval=1.0) / jnp.sqrt(fan_in)
    gamma = 1.0 + 0.1 * jax.random.normal(k_g, (COUT,), dtype=jnp.float32)
    beta = 0.1 * jax.random.normal(k_b, (COUT,), dtype=jnp.float32)
    running_mean = 0.1 * jax.random.normal(k_m, (COUT,), dtype=jnp.float32)
    running_var = 1.0 + 0.2 * jax.random.uniform(k_v, (COUT,), dtype=jnp.float32)

    # f32 path (exact BasicConv eval semantics).
    out = basic_conv(x, weight, gamma, beta, running_mean, running_var,
                     padding=PAD, compute_dtype=jnp.float32)
    out = jax.block_until_ready(out)
    ref = _reference(x, weight, gamma, beta, running_mean, running_var,
                     padding=PAD, compute_dtype=jnp.float32)
    assert out.shape == (N, COUT, H, W), out.shape
    assert jnp.allclose(out, ref, atol=1e-4, rtol=1e-4), \
        f"f32 max err {jnp.max(jnp.abs(out - ref))}"

    # bf16-operand path (recommended on v6e/v7x): bf16 matmul, f32 accumulate/epilogue.
    out_bf = basic_conv(x, weight, gamma, beta, running_mean, running_var,
                        padding=PAD, compute_dtype=jnp.bfloat16)
    out_bf = jax.block_until_ready(out_bf)
    ref_bf = _reference(x, weight, gamma, beta, running_mean, running_var,
                        padding=PAD, compute_dtype=jnp.bfloat16)
    assert jnp.allclose(out_bf, ref_bf, atol=5e-3, rtol=5e-3), \
        f"bf16 max err {jnp.max(jnp.abs(out_bf - ref_bf))}"

    print("KERNEL_OK")
</pallas_src>

<mosaic_0001>
module attributes {stable_mosaic.version = 11 : i64} {
  func.func @_basic_conv_kernel(%arg0: i32, %arg1: memref<1x4x16x16xf32, #tpu.memory_space<vmem>>, %arg2: memref<8x36xf32, #tpu.memory_space<vmem>>, %arg3: memref<8x1xf32, #tpu.memory_space<vmem>>, %arg4: memref<1x8x256xf32, #tpu.memory_space<vmem>>, %arg5: memref<4x18x18xf32, #tpu.memory_space<vmem>>) attributes {dimension_semantics = [#tpu.dimension_semantics<parallel>], iteration_bounds = array<i64: 2>, scalar_prefetch = 0 : i64, scratch_operands = 1 : i64, tpu.core_type = #tpu.core_type<tc>, window_params = [{transform_indices = @transform_0, window_bounds = array<i64: 1, 4, 16, 16>}, {pipeline_mode = #tpu.pipeline_mode<synchronous>, transform_indices = @transform_1, window_bounds = array<i64: 8, 36>}, {pipeline_mode = #tpu.pipeline_mode<synchronous>, transform_indices = @transform_2, window_bounds = array<i64: 8, 1>}, {transform_indices = @transform_3, window_bounds = array<i64: 1, 8, 256>}]} {
    %cst = arith.constant 0.000000e+00 : f32
    %0 = vector.broadcast %cst : f32 to vector<4x18x18xf32>
    %c0 = arith.constant 0 : index
    %c0_0 = arith.constant 0 : index
    %c0_1 = arith.constant 0 : index
    %1 = vector.load %arg5[%c0, %c0_0, %c0_1] : memref<4x18x18xf32, #tpu.memory_space<vmem>>, vector<4x18x18xf32>
    tpu.vector_store %arg5[%c0, %c0_0, %c0_1], %0 {strides = array<i32>} : memref<4x18x18xf32, #tpu.memory_space<vmem>>, vector<4x18x18xf32>,
    %c0_2 = arith.constant 0 : index
    %c0_3 = arith.constant 0 : index
    %c0_4 = arith.constant 0 : index
    %c0_5 = arith.constant 0 : index
    %2 = vector.load %arg1[%c0_2, %c0_3, %c0_4, %c0_5] : memref<1x4x16x16xf32, #tpu.memory_space<vmem>>, vector<1x4x16x16xf32>
    %3 = vector.shape_cast %2 : vector<1x4x16x16xf32> to vector<4x16x16xf32>
    %c0_6 = arith.constant 0 : index
    %c1 = arith.constant 1 : index
    %c1_7 = arith.constant 1 : index
    %4 = vector.load %arg5[%c0_6, %c1, %c1_7] : memref<4x18x18xf32, #tpu.memory_space<vmem>>, vector<4x16x16xf32>
    tpu.vector_store %arg5[%c0_6, %c1, %c1_7], %3 {strides = array<i32>} : memref<4x18x18xf32, #tpu.memory_space<vmem>>, vector<4x16x16xf32>,
    %c0_8 = arith.constant 0 : index
    %c0_9 = arith.constant 0 : index
    %c0_10 = arith.constant 0 : index
    %5 = vector.load %arg5[%c0_8, %c0_9, %c0_10] : memref<4x18x18xf32, #tpu.memory_space<vmem>>, vector<4x16x16xf32>
    %6 = vector.shape_cast %5 : vector<4x16x16xf32> to vector<4x256xf32>
    %c0_11 = arith.constant 0 : index
    %c0_12 = arith.constant 0 : index
    %c1_13 = arith.constant 1 : index
    %7 = vector.load %arg5[%c0_11, %c0_12, %c1_13] : memref<4x18x18xf32, #tpu.memory_space<vmem>>, vector<4x16x16xf32>
    %8 = vector.shape_cast %7 : vector<4x16x16xf32> to vector<4x256xf32>
    %c0_14 = arith.constant 0 : index
    %c0_15 = arith.constant 0 : index
    %c2 = arith.constant 2 : index
    %9 = vector.load %arg5[%c0_14, %c0_15, %c2] : memref<4x18x18xf32, #tpu.memory_space<vmem>>, vector<4x16x16xf32>
    %10 = vector.shape_cast %9 : vector<4x16x16xf32> to vector<4x256xf32>
    %c0_16 = arith.constant 0 : index
    %c1_17 = arith.constant 1 : index
    %c0_18 = arith.constant 0 : index
    %11 = vector.load %arg5[%c0_16, %c1_17, %c0_18] : memref<4x18x18xf32, #tpu.memory_space<vmem>>, vector<4x16x16xf32>
    %12 = vector.shape_cast %11 : vector<4x16x16xf32> to vector<4x256xf32>
    %c0_19 = arith.constant 0 : index
    %c1_20 = arith.constant 1 : index
    %c1_21 = arith.constant 1 : index
    %13 = vector.load %arg5[%c0_19, %c1_20, %c1_21] : memref<4x18x18xf32, #tpu.memory_space<vmem>>, vector<4x16x16xf32>
    %14 = vector.shape_cast %13 : vector<4x16x16xf32> to vector<4x256xf32>
    %c0_22 = arith.constant 0 : index
    %c1_23 = arith.constant 1 : index
    %c2_24 = arith.constant 2 : index
    %15 = vector.load %arg5[%c0_22, %c1_23, %c2_24] : memref<4x18x18xf32, #tpu.memory_space<vmem>>, vector<4x16x16xf32>
    %16 = vector.shape_cast %15 : vector<4x16x16xf32> to vector<4x256xf32>
    %c0_25 = arith.constant 0 : index
    %c2_26 = arith.constant 2 : index
    %c0_27 = arith.constant 0 : index
    %17 = vector.load %arg5[%c0_25, %c2_26, %c0_27] : memref<4x18x18xf32, #tpu.memory_space<vmem>>, vector<4x16x16xf32>
    %18 = vector.shape_cast %17 : vector<4x16x16xf32> to vector<4x256xf32>
    %c0_28 = arith.constant 0 : index
    %c2_29 = arith.constant 2 : index
    %c1_30 = arith.constant 1 : index
    %19 = vector.load %arg5[%c0_28, %c2_29, %c1_30] : memref<4x18x18xf32, #tpu.memory_space<vmem>>, vector<4x16x16xf32>
    %20 = vector.shape_cast %19 : vector<4x16x16xf32> to vector<4x256xf32>
    %c0_31 = arith.constant 0 : index
    %c2_32 = arith.constant 2 : index
    %c2_33 = arith.constant 2 : index
    %21 = vector.load %arg5[%c0_31, %c2_32, %c2_33] : memref<4x18x18xf32, #tpu.memory_space<vmem>>, vector<4x16x16xf32>
    %22 = vector.shape_cast %21 : vector<4x16x16xf32> to vector<4x256xf32>
    %23 = tpu.concatenate %6, %8, %10, %12, %14, %16, %18, %20, %22 in 0 : vector<4x256xf32>, vector<4x256xf32>, vector<4x256xf32>, vector<4x256xf32>, vector<4x256xf32>, vector<4x256xf32>, vector<4x256xf32>, vector<4x256xf32>, vector<4x256xf32> -> vector<36x256xf32>
    %c0_34 = arith.constant 0 : index
    %c0_35 = arith.constant 0 : index
    %24 = vector.load %arg2[%c0_34, %c0_35] : memref<8x36xf32, #tpu.memory_space<vmem>>, vector<8x36xf32>
    %cst_36 = arith.constant dense<0.000000e+00> : vector<8x256xf32>
    %25 = tpu.matmul %24, %23, %cst_36 {dimension_numbers = #tpu.dot_dimension_numbers<[1], [0], [0], [1], [0, 0, 1, 1], [], []>} : vector<8x36xf32>, vector<36x256xf32>, vector<8x256xf32> -> vector<8x256xf32>
    %c0_37 = arith.constant 0 : index
    %c0_38 = arith.constant 0 : index
    %26 = vector.load %arg3[%c0_37, %c0_38] : memref<8x1xf32, #tpu.memory_space<vmem>>, vector<8x1xf32>
    %27 = vector.broadcast %26 : vector<8x1xf32> to vector<8x256xf32>
    %28 = arith.addf %25, %27 : vector<8x256xf32>
    %cst_39 = arith.constant 0.000000e+00 : f32
    %29 = vector.broadcast %cst_39 : f32 to vector<8x256xf32>
    %30 = arith.maximumf %28, %29 : vector<8x256xf32>
    %c0_40 = arith.constant 0 : index
    %c0_41 = arith.constant 0 : index
    %c0_42 = arith.constant 0 : index
    %31 = vector.load %arg4[%c0_40, %c0_41, %c0_42] : memref<1x8x256xf32, #tpu.memory_space<vmem>>, vector<1x8x256xf32>
    %32 = vector.shape_cast %31 : vector<1x8x256xf32> to vector<8x256xf32>
    %33 = vector.shape_cast %30 : vector<8x256xf32> to vector<1x8x256xf32>
    tpu.vector_store %arg4[%c0_40, %c0_41, %c0_42], %33 {strides = array<i32>} : memref<1x8x256xf32, #tpu.memory_space<vmem>>, vector<1x8x256xf32>,
    return
  }
  func.func @transform_0(%arg0: i32) -> (i32, i32, i32, i32) {
    %c0_i32 = arith.constant 0 : i32
    %c0_i32_0 = arith.constant 0 : i32
    %c0_i32_1 = arith.constant 0 : i32
    %c0_i32_2 = arith.constant 0 : i32
    return %arg0, %c0_i32, %c0_i32_0, %c0_i32_1 : i32, i32, i32, i32
  }
  func.func @transform_1(%arg0: i32) -> (i32, i32) {
    %c0_i32 = arith.constant 0 : i32
    %c0_i32_0 = arith.constant 0 : i32
    %c0_i32_1 = arith.constant 0 : i32
    return %c0_i32, %c0_i32_0 : i32, i32
  }
  func.func @transform_2(%arg0: i32) -> (i32, i32) {
    %c0_i32 = arith.constant 0 : i32
    %c0_i32_0 = arith.constant 0 : i32
    %c0_i32_1 = arith.constant 0 : i32
    return %c0_i32, %c0_i32_0 : i32, i32
  }
  func.func @transform_3(%arg0: i32) -> (i32, i32, i32) {
    %c0_i32 = arith.constant 0 : i32
    %c0_i32_0 = arith.constant 0 : i32
    %c0_i32_1 = arith.constant 0 : i32
    return %arg0, %c0_i32, %c0_i32_0 : i32, i32, i32
  }
}

</mosaic_0001>

<bundles_post_ra>
// kernel: tpu_custom_call.1
= control target key start
LH: loop header
LB: loop body
LE: loop exit
PB: predicated region body
PF: predicated region fallthrough
CT: control target
= control target key end

     0   :  { %8 = vsyncpa [#allocation4], 0  ;;  %s4702_s0 = inlined_call_operand.hbm [shape: f32[2,4,16,16], index: 0, kind: input, shape index: {}]   ;;  %s4703_s1 = inlined_call_operand.vmem [shape: f32[8,36], index: 1, kind: input, shape index: {}]   ;;  %s4704_s2 = inlined_call_operand.vmem [shape: f32[8,1], index: 2, kind: input, shape index: {}]   ;;  %s4705_s3 = inlined_call_operand.hbm [shape: f32[2,8,256], index: 3, kind: output, shape index: {}]  }
   0x1   :  { %10 = vsyncpa [#allocation4 + $0x1], 0 }
   0x2   :  { %11 = vsyncpa [#allocation5], 0 }
   0x3   :  { %13 = vsyncpa [#allocation5 + $0x1], 0  ;;  %s2871_s12 = smov 0   ;;  %s2873_s13 = smov 0  }
   0x4   :  { %s2875_s14 = smov 0   ;;  %s2877_s15 = smov 0  }
   0x5 LB: > { %s2892_s16 = sadd.s32 4294967295, %s2833_s15   ;;  %s2273_s17 = sadd.s32 4294967294, %s2833_s15   ;;  %s2833_s15 = sphi %s2877_s15, %s4843_s15   ;;  %s2829_s14 = sphi %s2875_s14, %s4842_s14   ;;  %s2825_s13 = sphi %s2873_s13, %s4841_s13   ;;  %s2821_s12 = sphi %s2871_s12, %s4840_s12  }
   0x6   : > { %s2896_s18 = sadd.s32 1, %s2833_s15   ;;  %s26_s19 = sadd.s32 1, %s2829_s14 }
   0x7   : > { %s23_s20 = ssub.s32 %s2833_s15, %s2896_s18  ;;  %p33_p0 = scmp.ne.s32.totalorder %s2829_s14, %s2825_s13 }
   0x8   : > { %p24_p1 = scmp.eq.s32.totalorder %s23_s20, 0  ;;  %p34_p2 = scmp.eq.s32.totalorder %s2833_s15, 0 }
   0x9   : > { %p39_p3 = scmp.ne.s32.totalorder %s2825_s13, %s2821_s12  ;;  %p40_p4 = scmp.eq.s32.totalorder %s2892_s16, 0 }
   0xa   : > { %s2908_s21 = scalar_select %p24_p1, %s2829_s14, %s26_s19  }
   0xb   : > { %p2910_p5 = por %p34_p2, %p33_p0  ;;  %p2914_p6 = por %p40_p4, %p39_p3 }
   0xc   : > { %p105_p7 = scmp.eq.s32.totalorder %s2892_s16, 1  ;;  %p111_p8 = scmp.eq.s32.totalorder %s2273_s17, 1 }
   0xd   : > { %p2305_p10 = scmp.lt.s32.totalorder %s2833_s15, 2  ;;  %s137_s26 = sand.u32 1, %s2829_s14  }
   0xe   : > { %p2921_p11 = por %p105_p7, %p33_p0  ;;  %p2925_p12 = por %p111_p8, %p39_p3 }
   0xf   : > { %s2291_s27 = sshll.u32 %s2833_s15, 6  ;;  %s2276_s28 = sshll.u32 %s137_s26, 6 }
  0x10   : > { %s146_s4 = scalar_lea.hbm %s4702_s0, %s2291_s27  ;;  %s141_s6 = scalar_lea.vmem [#allocation3], %s2276_s28 }
  0x11   : > { %s147_s5 = sshll.u32 %s146_s4, 4  ;;  %s149_s7 = sshll.u32 %s141_s6, 4  ;;  %s148_s5 = int_to_ptr.hbm [resolvable:$true] %s147_s5  ;;  %s150_s7 = int_to_ptr.vmem [resolvable:$true] %s149_s7 }
  0x12   : > { %p2936_p13 = pnand %p2305_p10, %p2910_p5  ;;  %p2279_p0 = scmp.ge.s32.totalorder %s2833_s15, 1 }
  0x13   : > { %p157_p1 = scmp.lt.s32.totalorder %s2833_s15, 3  ;;  %s138_s9 = scalar_lea.sflag [#allocation4], %s137_s26 }
  0x14   : > { %s2737_s10 = sshra.s32 %s148_s5, 4  ;;  %p2741_p3 = pneg %p2936_p13  ;;  %s2738_s10 = int_to_ptr.hbm [resolvable:$true] %s2737_s10 }
  0x15   : > { %s2739_s11 = scalar_lea.hbm %s2738_s10, 64  ;;  %s2744_s20 = scalar_lea.hbm %s4702_s0, 128 }
  0x16   : > { %p2740_p2 = scmp.ne.s32.totalorder %s2738_s10, %s2739_s11  ;;  %p2745_p5 = scmp.lt.s32.totalorder %s2738_s10, %s4702_s0 }
  0x17   : > { %p2746_p8 = scmp.lt.s32.totalorder %s2744_s20, %s2739_s11 }
  0x18   : > { %p2742_p4 = pnand %p2741_p3, %p2740_p2 }
  0x19   : > { %p2747_p10 = por %p2746_p8, %p2745_p5 }
  0x1a   : > { %p2743_p7 = pneg %p2742_p4 }
  0x1c   : > { %p2748_p9 = pnand %p2747_p10, %p2743_p7 }
  0x1e   : > { %2751 = shalt.err (!%p2748_p9)
}
  0x1f   : > { %s2835_s26 = smov 128   ;;  %s2836_s28 = smov 8  }
  0x20   : > { %2300 = dma.hbm_to_vmem [thread:$0]  (!%p2936_p13), %s148_s5, 1024, %s150_s7, %s138_s9, %s2835_s26, %s2835_s26, %s2836_s28  }
  0x21   : > { %p158_p2 = pnand %p2279_p0, %p157_p1 }
  0x23   : > { %161 = sbr.rel (%p158_p2) target bundleno = 734 (0x2de), region = 32 }
  0x28   : > { %s2957_s29 = sand.u32 1, %s2825_s13  }
  0x29   : > { %s2280_s30 = sshll.u32 %s2957_s29, 6  ;;  %s164_s4 = scalar_lea.sflag [#allocation4], %s2957_s29 }
  0x2a   : > { %s167_s6 = scalar_lea.vmem [#allocation3], %s2280_s30 }
  0x2b   : > { %2812 = dma.done.wait (%p2914_p6), %s164_s4, 1024  }
  0x2c   : > { %2814 = vsyncadd (%p2914_p6), %s164_s4, 4294966272  ;;  %vm191_vm0 = vcmask 146432   ;;  %v2837_v0 = vmov 0.0   ;;  %v207_v1 = vld [vmem:[%s167_s6 + $0x10] sm:$0xff]  ;;  %v205_v2 = vld [vmem:[%s167_s6] sm:$0xff]  ;;  %s2838_s5 = smov 1  }
  0x2d   : > { %199 = vst.msk [vmem:[#allocation2 + $0x30] sm:$0xff] %vm191_vm0, %v2837_v0  ;;  %225 = vrot.lane.b32.xlu1 %v207_v1, %s2838_s5  ;;  %221 = vrot.lane.b32.xlu0 %v205_v2, %s2838_s5  ;;  %v209_v3 = vld [vmem:[%s167_s6 + $0x20] sm:$0xff]  ;;  %v208_v4 = vld [vmem:[%s167_s6 + $0x18] sm:$0xff]  ;;  %vm194_vm1 = vcmask 140288   ;;  %vm245_vm2 = vcmask 138248   ;;  %s2839_s23 = smov 127  }
  0x2e   : > { %200 = vst.msk [vmem:[#allocation2 + $0x38] sm:$0xff] %vm191_vm0, %v2837_v0  ;;  %229 = vrot.lane.b32.xlu2 %v209_v3, %s2838_s5  ;;  %v206_v5 = vld [vmem:[%s167_s6 + $0x8] sm:$0xff]  ;;  %v212_v7 = vld [vmem:[%s167_s6 + $0x38] sm:$0xff]  ;;  %v211_v8 = vld [vmem:[%s167_s6 + $0x30] sm:$0xff]  ;;  %vm263_vm3 = vcmask 1047556   ;;  %s2841_s7 = smov 126  }
  0x2f   : > { %192 = vst.msk [vmem:[#allocation2] sm:$0xff] %vm191_vm0, %v2837_v0  ;;  %v210_v6 = vld [vmem:[%s167_s6 + $0x28] sm:$0xff]  ;;  %v2840_v28 = vmov 1983009808   ;;  %v2842_v42 = vmov 1934713408  }
  0x30   : > { %193 = vst.msk [vmem:[#allocation2 + $0x8] sm:$0xff] %vm191_vm0, %v2837_v0  ;;  %v268_v29 = vunpack.c.l.s4 %v2840_v28  ;;  %v292_v43 = vunpack.c.l.s4 %v2842_v42  ;;  %s2843_s8 = smov 96   ;;  %s2844_s9 = smov 64   ;;  %vm431_vm4 = vcmask 130048   ;;  %vm433_vm5 = vcmask 261120  }
  0x31   : > { %196 = vst.msk [vmem:[#allocation2 + $0x18] sm:$0xff] %vm191_vm0, %v2837_v0  ;;  %s2845_s10 = smov 32   ;;  %s2846_s11 = smov 16   ;;  %vm435_vm6 = vcmask 392192   ;;  %vm437_vm7 = vcmask 523264   ;;  %vm439_vm8 = vcmask 654336  }
  0x32   : > { %197 = vst.msk [vmem:[#allocation2 + $0x20] sm:$0xff] %vm191_vm0, %v2837_v0  ;;  %v2982_v34 = vunpack.c.0.s8 %v268_v29  ;;  %v2996_v52 = vunpack.c.0.s8 %v292_v43  ;;  %s2847_s17 = smov 48   ;;  %s2848_s19 = smov 112   ;;  %vm441_vm9 = vcmask 785408   ;;  %vm443_vm10 = vcmask 916480  }
  0x33   : > { %202 = vst.msk [vmem:[#allocation2 + $0x48] sm:$0xff] %vm191_vm0, %v2837_v0  ;;  %s2849_s20 = smov 80   ;;  %vm2116_vm11 = vcmask 1043456   ;;  %vm2132_vm12 = vcmask 293888   ;;  %s2281_s30 = sshll.u32 %s2957_s29, 4 }
  0x34   : > { %203 = vst.msk [vmem:[#allocation2 + $0x50] sm:$0xff] %vm191_vm0, %v2837_v0  ;;  %s2292_s4 = sshll.u32 %s2892_s16, 4  ;;  %s2187_s16 = scalar_lea.sflag [#allocation5], %s2957_s29 }
  0x35   : > { %227 = vrot.lane.b32.xlu1 %v208_v4, %s2838_s5  ;;  %223 = vrot.lane.b32.xlu0 %v206_v5, %s2838_s5  ;;  %201 = vst.msk [vmem:[#allocation2 + $0x40] sm:$0x3] %vm194_vm1, %v2837_v0 }
  0x36   : > { %231 = vrot.lane.b32.xlu2 %v210_v6, %s2838_s5  ;;  %195 = vst.msk [vmem:[#allocation2 + $0x10] sm:$0x3] %vm194_vm1, %v2837_v0 }
  0x37   : > { %198 = vst.msk [vmem:[#allocation2 + $0x28] sm:$0x3] %vm194_vm1, %v2837_v0 }
  0x38   : > { %204 = vst.msk [vmem:[#allocation2 + $0x58] sm:$0x3] %vm194_vm1, %v2837_v0 }
  0x3d   : > { %235 = vrot.lane.b32.xlu1 %v212_v7, %s2838_s5  ;;  %233 = vrot.lane.b32.xlu0 %v211_v8, %s2838_s5 }
  0x88   : > { %v230_v9 = vpop.permute.xlu2 %229 }
  0x89   : > { %250 = vst.msk [vmem:[#allocation2 + $0x31] sm:$0xff] %vm245_vm2, %v230_v9 }
  0x90   : > { %v232_v10 = vpop.permute.xlu2 %231  ;;  %v258_v11 = vld [vmem:[#allocation2 + $0x30] sm:$0xff] }
  0x91   : > { %251 = vst.msk [vmem:[#allocation2 + $0x39] sm:$0xff] %vm245_vm2, %v232_v10  ;;  %v262_v16 = vrot.slane %v258_v11, 4  ;;  %v2999_v55 = vld [vmem:[#allocation2 + $0x31] sm:$0xff] }
  0x98   : > { %v259_v12 = vld [vmem:[#allocation2 + $0x38] sm:$0xff] }
  0x99   : > { %v2365_v13 = vpack.i.bf16 %v259_v12, %v258_v11  ;;  %v319_v21 = vrot.slane %v259_v12, 4  ;;  %v2993_v51 = vld [vmem:[#allocation2 + $0x39] sm:$0xff] }
  0x9a   : > { %v3005_v59 = vpack.i.bf16 %v2993_v51, %v2999_v55 }
  0x9b   : > { %2366 = vrot.lane.b32.xlu2 %v2365_v13, %s2839_s23 }
  0x9f   : > { %v226_v14 = vpop.permute.xlu1 %225  ;;  %v222_v15 = vpop.permute.xlu0 %221 }
  0xa0   : > { %248 = vst.msk [vmem:[#allocation2 + $0x19] sm:$0xff] %vm245_vm2, %v226_v14 }
  0xa1   : > { %246 = vst.msk [vmem:[#allocation2 + $0x1] sm:$0xff] %vm245_vm2, %v222_v15 }
  0xa7   : > { %v228_v17 = vpop.permute.xlu1 %227  ;;  %v224_v18 = vpop.permute.xlu0 %223  ;;  %v256_v24 = vld [vmem:[#allocation2 + $0x18] sm:$0xff] }
  0xa8   : > { %249 = vst.msk [vmem:[#allocation2 + $0x21] sm:$0xff] %vm245_vm2, %v228_v17  ;;  %v254_v19 = vld [vmem:[#allocation2] sm:$0xff]  ;;  %v277_v38 = vrot.slane %v256_v24, 4 }
  0xa9   : > { %247 = vst.msk [vmem:[#allocation2 + $0x9] sm:$0xff] %vm245_vm2, %v224_v18  ;;  %v264_v20 = vsel %vm263_vm3, %v262_v16, %v254_v19  ;;  %v265_v32 = vrot.slane %v254_v19, 4  ;;  %v3013_v4 = vld [vmem:[#allocation2 + $0x1] sm:$0xff] }
  0xaa   : > { %v270_v44 = vperm.slane %v264_v20, %v2982_v34 }
  0xab   : > { %v266_v35 = vsel %vm263_vm3, %v258_v11, %v265_v32 }
  0xac   : > { %v274_v41 = vperm.slane %v266_v35, %v2982_v34  ;;  %v289_v62 = vrot.slane %v270_v44, 4 }
  0xae   : > { %v301_v53 = vrot.slane %v274_v41, 4 }
  0xaf   : > { %v236_v22 = vpop.permute.xlu1 %235  ;;  %v234_v23 = vpop.permute.xlu0 %233  ;;  %v257_v25 = vld [vmem:[#allocation2 + $0x20] sm:$0xff] }
  0xb0   : > { %253 = vst.msk [vmem:[#allocation2 + $0x51] sm:$0xff] %vm245_vm2, %v236_v22  ;;  %v2974_v26 = vpack.i.bf16 %v257_v25, %v256_v24  ;;  %v255_v27 = vld [vmem:[#allocation2 + $0x8] sm:$0xff]  ;;  %v333_v37 = vrot.slane %v257_v25, 4 }
  0xb1   : > { %252 = vst.msk [vmem:[#allocation2 + $0x49] sm:$0xff] %vm245_vm2, %v234_v23  ;;  %v320_v30 = vsel %vm263_vm3, %v319_v21, %v255_v27  ;;  %v2375_v31 = vpack.i.bf16 %v255_v27, %v254_v19  ;;  %v321_v33 = vrot.slane %v255_v27, 4  ;;  %v3007_v60 = vld [vmem:[#allocation2 + $0x9] sm:$0xff]  ;;  %v3060_v27 = vld [vmem:[#allocation2 + $0x19] sm:$0xff] }
  0xb2   : > { %2361 = vrot.lane.b32.xlu1 %v2974_v26, %s2839_s23  ;;  %v326_v54 = vperm.slane %v320_v30, %v2982_v34  ;;  %v2395_v9 = vpack.i.bf16 %v3007_v60, %v3013_v4 }
  0xb3   : > { %2376 = vrot.lane.b32.xlu2 %v2375_v31, %s2841_s7  ;;  %2356 = vrot.lane.b32.xlu0 %v2375_v31, %s2839_s23  ;;  %v322_v36 = vsel %vm263_vm3, %v259_v12, %v321_v33 }
  0xb4   : > { %v330_v47 = vperm.slane %v322_v36, %v2982_v34  ;;  %v345_v12 = vrot.slane %v326_v54, 4 }
  0xb6   : > { %v357_v58 = vrot.slane %v330_v47, 4 }
  0xb7   : > { %v3052_v22 = vld [vmem:[#allocation2 + $0x51] sm:$0xff] }
  0xb8   : > { %v260_v39 = vld [vmem:[#allocation2 + $0x48] sm:$0xff]  ;;  %v261_v40 = vld [vmem:[#allocation2 + $0x50] sm:$0xff] }
  0xb9   : > { %v331_v45 = vrot.slane %v261_v40, 4  ;;  %v2390_v46 = vpack.i.bf16 %v261_v40, %v260_v39  ;;  %v275_v48 = vrot.slane %v260_v39, 4  ;;  %v278_v49 = vsel %vm263_vm3, %v260_v39, %v277_v38  ;;  %v3050_v21 = vld [vmem:[#allocation2 + $0x49] sm:$0xff]  ;;  %v3072_v32 = vld [vmem:[#allocation2 + $0x52] sm:$0xff] }
  0xba   : > { %2386 = vrot.lane.b32.xlu1 %v2365_v13, %s2841_s7  ;;  %v334_v50 = vsel %vm263_vm3, %v261_v40, %v333_v37  ;;  %v286_v56 = vperm.slane %v278_v49, %v2982_v34  ;;  %v3070_v31 = vld [vmem:[#allocation2 + $0x4a] sm:$0xff]  ;;  %v2420_v38 = vpack.i.bf16 %v3050_v21, %v3060_v27  ;;  %v3107_v49 = vld [vmem:[#allocation2 + $0x1a] sm:$0xff] }
  0xbb   : > { %2391 = vrot.lane.b32.xlu2 %v2390_v46, %s2841_s7  ;;  %2371 = vrot.lane.b32.xlu0 %v2390_v46, %s2839_s23  ;;  %v342_v57 = vperm.slane %v334_v50, %v2982_v34  ;;  %v276_v61 = vsel %vm263_vm3, %v275_v48, %v256_v24  ;;  %v332_v63 = vsel %vm263_vm3, %v331_v45, %v257_v25  ;;  %v3056_v24 = vld [vmem:[#allocation2 + $0x21] sm:$0xff] }
  0xbc   : > { %v302_v0 = vsel %vm263_vm3, %v286_v56, %v301_v53  ;;  %v299_v2 = vrot.slane %v286_v56, 4  ;;  %v282_v7 = vperm.slane %v276_v61, %v2982_v34  ;;  %v338_v8 = vperm.slane %v332_v63, %v2982_v34  ;;  %v3109_v50 = vld [vmem:[#allocation2 + $0x22] sm:$0xff] }
  0xbd   : > { %v358_v1 = vsel %vm263_vm3, %v342_v57, %v357_v58  ;;  %v355_v3 = vrot.slane %v342_v57, 4  ;;  %v3016_v5 = vperm.slane %v302_v0, %v2996_v52  ;;  %v2400_v28 = vpack.i.bf16 %v3056_v24, %v3060_v27  ;;  %v3121_v58 = vld [vmem:[#allocation2 + $0xa] sm:$0xff]  ;;  %v3123_v61 = vld [vmem:[#allocation2 + $0x2] sm:$0xff] }
  0xbe   : > { %v3019_v6 = vperm.slane %v358_v1, %v2996_v52  ;;  %v300_v10 = vsel %vm263_vm3, %v299_v2, %v274_v41  ;;  %v290_v16 = vsel %vm263_vm3, %v282_v7, %v289_v62  ;;  %v346_v17 = vsel %vm263_vm3, %v338_v8, %v345_v12  ;;  %v3133_v1 = vld [vmem:[#allocation2 + $0x32] sm:$0xff]  ;;  %v3135_v2 = vld [vmem:[#allocation2 + $0x3a] sm:$0xff] }
  0xbf   : > { %v356_v11 = vsel %vm263_vm3, %v355_v3, %v330_v47  ;;  %v3032_v14 = vperm.slane %v300_v10, %v2996_v52  ;;  %v3045_v19 = vperm.slane %v290_v16, %v2996_v52  ;;  %v3048_v20 = vperm.slane %v346_v17, %v2996_v52 }
  0xc0   : > { %v2465_v13 = vpack.i.bf16 %v3019_v6, %v3016_v5  ;;  %v3035_v15 = vperm.slane %v356_v11, %v2996_v52  ;;  %v287_v25 = vrot.slane %v282_v7, 4  ;;  %v343_v29 = vrot.slane %v338_v8, 4 }
  0xc1   : > { %v2455_v23 = vpack.i.bf16 %v3048_v20, %v3045_v19  ;;  %v315_v35 = vrot.slane %v3032_v14, 4  ;;  %v313_v37 = vrot.slane %v3045_v19, 4  ;;  %v369_v39 = vrot.slane %v3048_v20, 4 }
  0xc2   : > { %2406 = vrot.lane.b32.xlu1 %v3005_v59, %s2839_s23  ;;  %v2460_v18 = vpack.i.bf16 %v3035_v15, %v3032_v14  ;;  %v3068_v30 = vsel %vm263_vm3, %v287_v25, %v270_v44  ;;  %v3075_v33 = vsel %vm263_vm3, %v343_v29, %v326_v54  ;;  %v371_v36 = vrot.slane %v3035_v15, 4 }
  0xc3   : > { %2396 = vrot.lane.b32.xlu2 %v2395_v9, %s2839_s23  ;;  %2381 = vrot.lane.b32.xlu0 %v2974_v26, %s2841_s7  ;;  %v2410_v26 = vpack.i.bf16 %v3052_v22, %v3050_v21  ;;  %v2425_v40 = vpack.i.bf16 %v3072_v32, %v3070_v31  ;;  %v3088_v41 = vsel %vm263_vm3, 0.0, %v315_v35  ;;  %v3094_v43 = vsel %vm263_vm3, 0.0, %v313_v37 }
  0xc4   : > { %v3091_v42 = vsel %vm263_vm3, 0.0, %v371_v36  ;;  %v3100_v45 = vsel %vm263_vm3, 0.0, %v369_v39  ;;  %v317_v46 = vrot.slane %v3016_v5, 4  ;;  %v373_v48 = vrot.slane %v3019_v6, 4 }
  0xc5   : > { %v2505_v44 = vpack.i.bf16 %v3091_v42, %v3088_v41  ;;  %v2500_v47 = vpack.i.bf16 %v3100_v45, %v3094_v43  ;;  %v2435_v57 = vpack.i.bf16 %v3109_v50, %v3107_v49  ;;  %v2430_v62 = vpack.i.bf16 %v3056_v24, %v3052_v22 }
  0xc6   : > { %v3112_v53 = vsel %vm263_vm3, 0.0, %v317_v46  ;;  %v3115_v54 = vsel %vm263_vm3, 0.0, %v373_v48  ;;  %v1548_v63 = vrot.slane %v3121_v58, 4  ;;  %v1492_v0 = vrot.slane %v3123_v61, 4 }
  0xc7   : > { %v2510_v56 = vpack.i.bf16 %v3115_v54, %v3112_v53  ;;  %v1504_v3 = vrot.slane %v3107_v49, 4  ;;  %v1560_v7 = vrot.slane %v3109_v50, 4  ;;  %v2440_v11 = vpack.i.bf16 %v3135_v2, %v3133_v1 }
  0xc8   : > { %v1549_v8 = vsel %vm263_vm3, %v3135_v2, %v1548_v63  ;;  %v880_v48 = vrot.slane %v2999_v55, 4  ;;  %v882_v63 = vrot.slane %v3013_v4, 4  ;;  %v3301_v20 = vperm.slane %v3068_v30, %v2996_v52 }
  0xc9   : > { %v1505_v10 = vsel %vm263_vm3, %v3070_v31, %v1504_v3  ;;  %v1561_v12 = vsel %vm263_vm3, %v3072_v32, %v1560_v7  ;;  %v3155_v17 = vperm.slane %v1549_v8, %v2982_v34  ;;  %v938_v7 = vrot.slane %v3007_v60, 4 }
  0xca   : > { %2416 = vrot.lane.b32.xlu1 %v2395_v9, %s2841_s7  ;;  %v1493_v9 = vsel %vm263_vm3, %v3133_v1, %v1492_v0  ;;  %v3159_v25 = vperm.slane %v1505_v10, %v2982_v34 }
  0xcb   : > { %2411 = vrot.lane.b32.xlu2 %v2410_v26, %s2839_s23  ;;  %2401 = vrot.lane.b32.xlu0 %v2400_v28, %s2839_s23  ;;  %v3152_v16 = vperm.slane %v1493_v9, %v2982_v34  ;;  %v3164_v26 = vperm.slane %v1561_v12, %v2982_v34  ;;  %v1584_v29 = vrot.slane %v3155_v17, 4  ;;  %v892_v12 = vrot.slane %v3050_v21, 4 }
  0xcc   : > { %v1526_v15 = vrot.slane %v3159_v25, 4 }
  0xcd   : > { %v1528_v28 = vrot.slane %v3152_v16, 4  ;;  %v1585_v36 = vsel %vm263_vm3, %v3164_v26, %v1584_v29 }
  0xce   : > { %v1527_v30 = vsel %vm263_vm3, %v1526_v15, %v3152_v16 }
  0xcf   : > { %v1529_v35 = vsel %vm263_vm3, %v3159_v25, %v1528_v28  ;;  %v881_v28 = vsel %vm263_vm3, %v880_v48, %v3013_v4  ;;  %v1546_v48 = vrot.slane %v3135_v2, 4 }
  0xd0   : > { %v3173_v37 = vperm.slane %v1529_v35, %v2996_v52  ;;  %v2450_v35 = vpack.i.bf16 %v3121_v58, %v3123_v61  ;;  %v3223_v4 = vperm.slane %v881_v28, %v2982_v34 }
  0xd2   : > { %1898 = vrot.lane.b32.xlu1 %v3070_v31, %s2841_s7  ;;  %4748 = vst [vmem:[#allocation9_spill] sm:$0xff] %v3173_v37 }
  0xd3   : > { %2421 = vrot.lane.b32.xlu2 %v2420_v38, %s2841_s7  ;;  %2426 = vrot.lane.b32.xlu0 %v2425_v40, %s2839_s23  ;;  %v3176_v38 = vperm.slane %v1585_v36, %v2996_v52  ;;  %v1544_v40 = vrot.slane %v3173_v37, 4 }
  0xd5   : > { %4749 = vst [vmem:[#allocation10_spill] sm:$0xff] %v3176_v38  ;;  %v1600_v46 = vrot.slane %v3176_v38, 4  ;;  %v3194_v0 = vsel %vm263_vm3, 0.0, %v1544_v40 }
  0xd6   : > { %4750 = vst [vmem:[#allocation11_spill] sm:$0xff] %v3194_v0 }
  0xd7   : > { %v3197_v3 = vsel %vm263_vm3, 0.0, %v1600_v46  ;;  %v893_v46 = vsel %vm263_vm3, %v892_v12, %v3060_v27 }
  0xd8   : > { %4751 = vst [vmem:[#allocation12_spill] sm:$0xff] %v3197_v3 }
  0xda   : > { %2436 = vrot.lane.b32.xlu1 %v2435_v57, %s2839_s23  ;;  %v950_v57 = vrot.slane %v3056_v24, 4 }
  0xdb   : > { %1900 = vrot.lane.b32.xlu2 %v3072_v32, %s2841_s7  ;;  %2431 = vrot.lane.b32.xlu0 %v2430_v62, %s2841_s7  ;;  %v894_v62 = vrot.slane %v3060_v27, 4  ;;  %v3240_v27 = vperm.slane %v893_v46, %v2982_v34 }
  0xdc   : > { %v951_v9 = vsel %vm263_vm3, %v3052_v22, %v950_v57 }
  0xdd   : > { %v895_v8 = vsel %vm263_vm3, %v3050_v21, %v894_v62  ;;  %v959_v40 = vperm.slane %v951_v9, %v2982_v34  ;;  %v939_v21 = vsel %vm263_vm3, %v2993_v51, %v938_v7  ;;  %v906_v7 = vrot.slane %v3223_v4, 4 }
  0xde   : > { %v903_v36 = vperm.slane %v895_v8, %v2982_v34  ;;  %v947_v62 = vperm.slane %v939_v21, %v2982_v34  ;;  %v1502_v8 = vrot.slane %v3070_v31, 4  ;;  %v1558_v9 = vrot.slane %v3072_v32, 4 }
  0xdf   : > { %v907_v31 = vsel %vm263_vm3, %v3240_v27, %v906_v7  ;;  %v904_v7 = vrot.slane %v3240_v27, 4 }
  0xe1   : > { %v905_v27 = vsel %vm263_vm3, %v904_v7, %v3223_v4 }
  0xe2   : > { %1892 = vrot.lane.b32.xlu1 %v3109_v50, %s2841_s7 }
  0xe3   : > { %2441 = vrot.lane.b32.xlu2 %v2440_v11, %s2839_s23  ;;  %1890 = vrot.lane.b32.xlu0 %v3107_v49, %s2841_s7  ;;  %v948_v11 = vrot.slane %v3052_v22, 4  ;;  %v883_v22 = vsel %vm263_vm3, %v2999_v55, %v882_v63  ;;  %v916_v55 = vrot.slane %v903_v36, 4  ;;  %v1547_v63 = vsel %vm263_vm3, %v1546_v48, %v3121_v58 }
  0xea   : > { %2446 = vrot.lane.b32.xlu1 %v3005_v59, %s2841_s7  ;;  %v936_v59 = vrot.slane %v2993_v51, 4  ;;  %v891_v51 = vperm.slane %v883_v22, %v2982_v34  ;;  %v1559_v22 = vsel %vm263_vm3, %v1558_v9, %v3109_v50  ;;  %v1582_v50 = vrot.slane %v3164_v26, 4 }
  0xeb   : > { %1894 = vrot.lane.b32.xlu2 %v3133_v1, %s2841_s7  ;;  %1896 = vrot.lane.b32.xlu0 %v3135_v2, %s2841_s7 }
  0xec   : > { %v937_v29 = vsel %vm263_vm3, %v936_v59, %v3007_v60  ;;  %v949_v60 = vsel %vm263_vm3, %v948_v11, %v3056_v24  ;;  %v972_v59 = vrot.slane %v959_v40, 4  ;;  %v1490_v24 = vrot.slane %v3133_v1, 4 }
  0xed   : > { %v3232_v57 = vperm.slane %v937_v29, %v2982_v34  ;;  %v3243_v2 = vperm.slane %v949_v60, %v2982_v34  ;;  %v917_v12 = vsel %vm263_vm3, %v916_v55, %v891_v51  ;;  %v918_v29 = vrot.slane %v891_v51, 4 }
  0xee   : > { %v1491_v11 = vsel %vm263_vm3, %v1490_v24, %v3123_v61  ;;  %v973_v28 = vsel %vm263_vm3, %v972_v59, %v947_v62  ;;  %v3284_v21 = vperm.slane %v917_v12, %v2996_v52  ;;  %v1583_v48 = vsel %vm263_vm3, %v1582_v50, %v3155_v17 }
  0xef   : > { %v962_v1 = vrot.slane %v3232_v57, 4  ;;  %v919_v5 = vsel %vm263_vm3, %v903_v36, %v918_v29  ;;  %v3287_v14 = vperm.slane %v973_v28, %v2996_v52  ;;  %v311_v55 = vrot.slane %v3301_v20, 4 }
  0xf0   : > { %v3294_v36 = vperm.slane %v919_v5, %v2996_v52  ;;  %v3335_v24 = vperm.slane %v1527_v30, %v2996_v52 }
  0xf1   : > { %v963_v32 = vsel %vm263_vm3, %v3243_v2, %v962_v1  ;;  %v2475_v60 = vpack.i.bf16 %v3287_v14, %v3284_v21  ;;  %v312_v1 = vsel %vm263_vm3, 0.0, %v311_v55  ;;  %v988_v15 = vrot.slane %v3287_v14, 4 }
  0xf2   : > { %1888 = vrot.lane.b32.xlu1 %v3121_v58, %s2841_s7  ;;  %v3264_v58 = vperm.slane %v1547_v63, %v2982_v34  ;;  %v3338_v63 = vperm.slane %v1583_v48, %v2996_v52 }
  0xf3   : > { %2451 = vrot.lane.b32.xlu2 %v2450_v35, %s2839_s23  ;;  %1886 = vrot.lane.b32.xlu0 %v3123_v61, %s2841_s7  ;;  %v974_v35 = vrot.slane %v947_v62, 4  ;;  %v3267_v61 = vperm.slane %v1491_v11, %v2982_v34  ;;  %s2198_s23 = scalar_lea.hbm %s4705_s3, %s2292_s4  ;;  %s190_s7 = scalar_lea.vmem [#allocation6], %s2281_s30 }
  0xf4   : > { %v1572_v26 = vrot.slane %v3264_v58, 4  ;;  %v2490_v28 = vpack.i.bf16 %v3338_v63, %v3335_v24  ;;  %v1598_v30 = vrot.slane %v3338_v63, 4 }
  0xf5   : > { %v975_v6 = vsel %vm263_vm3, %v959_v40, %v974_v35  ;;  %v3311_v40 = vperm.slane %v1559_v22, %v2982_v34  ;;  %v3327_v59 = vpop.permute.xlu2 %2366  ;;  %v932_v22 = vrot.slane %v3284_v21, 4 }
  0xf6   : > { %v3297_v19 = vperm.slane %v975_v6, %v2996_v52 }
  0xf7   : > { %v1573_v17 = vsel %vm263_vm3, %v3311_v40, %v1572_v26  ;;  %v1570_v45 = vrot.slane %v3311_v40, 4  ;;  %v933_v54 = vsel %vm263_vm3, 0.0, %v932_v22 }
  0xf8   : > { %v2480_v51 = vpack.i.bf16 %v3297_v19, %v3294_v36  ;;  %v1581_v11 = vperm.slane %v1573_v17, %v2996_v52  ;;  %v990_v50 = vrot.slane %v3297_v19, 4 }
  0xfa   : > { %2466 = vrot.lane.b32.xlu1 %v2465_v13, %s2843_s8  ;;  %v1503_v13 = vsel %vm263_vm3, %v1502_v8, %v3107_v49  ;;  %v971_v49 = vperm.slane %v963_v32, %v2996_v52  ;;  %v960_v8 = vrot.slane %v3243_v2, 4  ;;  %v3358_v32 = vperm.slane %v905_v27, %v2996_v52 }
  0xfb   : > { %2461 = vrot.lane.b32.xlu2 %v2460_v18, %s2844_s9  ;;  %2456 = vrot.lane.b32.xlu0 %v2455_v23, %s2845_s10  ;;  %v915_v18 = vperm.slane %v907_v31, %v2996_v52  ;;  %v3305_v23 = vperm.slane %v3075_v33, %v2996_v52  ;;  %v3308_v25 = vperm.slane %v1503_v13, %v2982_v34  ;;  %v1516_v33 = vrot.slane %v3267_v61, 4 }
  0xfc   : > { %v961_v2 = vsel %vm263_vm3, %v960_v8, %v3232_v57  ;;  %4752 = vst [vmem:[#allocation13_spill] sm:$0xff] %v3358_v32  ;;  %v928_v6 = vrot.slane %v3358_v32, 4  ;;  %v986_v13 = vrot.slane %v971_v49, 4  ;;  %v1596_v40 = vrot.slane %v1581_v11, 4 }
  0xfd   : > { %v2470_v46 = vpack.i.bf16 %v971_v49, %v915_v18  ;;  %v367_v62 = vrot.slane %v3305_v23, 4  ;;  %v1517_v16 = vsel %vm263_vm3, %v3308_v25, %v1516_v33  ;;  %v3361_v5 = vperm.slane %v961_v2, %v2996_v52 }
  0xfe   : > { %v1525_v9 = vperm.slane %v1517_v16, %v2996_v52  ;;  %v930_v57 = vrot.slane %v915_v18, 4  ;;  %v1514_v43 = vrot.slane %v3308_v25, 4  ;;  %v929_v21 = vsel %vm263_vm3, 0.0, %v928_v6 }
  0xff   : > { %v368_v12 = vsel %vm263_vm3, 0.0, %v367_v62  ;;  %4753 = vst [vmem:[#allocation14_spill] sm:$0xff] %v3361_v5  ;;  %v984_v4 = vrot.slane %v3361_v5, 4  ;;  %v987_v53 = vsel %vm263_vm3, 0.0, %v986_v13  ;;  %v934_v49 = vrot.slane %v3294_v36, 4 }
 0x100   : > { %v2495_v29 = vpack.i.bf16 %v368_v12, %v312_v1  ;;  %v2485_v35 = vpack.i.bf16 %v1581_v11, %v1525_v9  ;;  %v931_v18 = vsel %vm263_vm3, 0.0, %v930_v57  ;;  %v1540_v25 = vrot.slane %v1525_v9, 4 }
 0x101   : > { %v985_v14 = vsel %vm263_vm3, 0.0, %v984_v4  ;;  %v2520_v42 = vpack.i.bf16 %v987_v53, %v931_v18  ;;  %v1515_v26 = vsel %vm263_vm3, %v1514_v43, %v3267_v61  ;;  %v935_v19 = vsel %vm263_vm3, 0.0, %v934_v49 }
 0x102   : > { %2476 = vrot.lane.b32.xlu1 %v2475_v60, %s2844_s9  ;;  %v2515_v41 = vpack.i.bf16 %v985_v14, %v929_v21  ;;  %v1571_v60 = vsel %vm263_vm3, %v1570_v45, %v3264_v58  ;;  %v991_v48 = vsel %vm263_vm3, 0.0, %v990_v50  ;;  %v3405_v33 = vperm.slane %v1515_v26, %v2996_v52 }
 0x103   : > { %2471 = vrot.lane.b32.xlu2 %v2470_v46, %s2845_s10  ;;  %2481 = vrot.lane.b32.xlu0 %v2480_v51, %s2843_s8  ;;  %v1542_v46 = vrot.slane %v3335_v24, 4  ;;  %v3408_v61 = vperm.slane %v1571_v60, %v2996_v52  ;;  %v1541_v58 = vsel %vm263_vm3, 0.0, %v1540_v25  ;;  %v1597_v51 = vsel %vm263_vm3, 0.0, %v1596_v40 }
 0x104   : > { %4754 = vst [vmem:[#allocation15_spill] sm:$0xff] %v3405_v33  ;;  %v1599_v62 = vsel %vm263_vm3, 0.0, %v1598_v30  ;;  %v2530_v16 = vpack.i.bf16 %v991_v48, %v935_v19  ;;  %v2540_v17 = vpack.i.bf16 %v1597_v51, %v1541_v58  ;;  %v1538_v24 = vrot.slane %v3405_v33, 4 }
 0x105   : > { %4755 = vst [vmem:[#allocation16_spill] sm:$0xff] %v3408_v61  ;;  %v1543_v55 = vsel %vm263_vm3, 0.0, %v1542_v46  ;;  %v1594_v63 = vrot.slane %v3408_v61, 4 }
 0x106   : > { %v2545_v7 = vpack.i.bf16 %v1599_v62, %v1543_v55  ;;  %v1539_v1 = vsel %vm263_vm3, 0.0, %v1538_v24 }
 0x107   : > { %v1595_v12 = vsel %vm263_vm3, 0.0, %v1594_v63 }
 0x10a   : > { %2491 = vrot.lane.b32.xlu1 %v2490_v28, %s2844_s9  ;;  %v2369_v28 = vunpack.i.h.bf16 %v3327_v59 }
 0x10b   : > { %2496 = vrot.lane.b32.xlu2 %v2495_v29, %s2846_s11  ;;  %2486 = vrot.lane.b32.xlu0 %v2485_v35, %s2845_s10  ;;  %v2368_v29 = vunpack.i.l.bf16 %v3327_v59  ;;  %v2535_v35 = vpack.i.bf16 %v1595_v12, %v1539_v1 }
 0x10c   : > { %v540_v22 = vrot.slane %v2369_v28, 4 }
 0x10d   : > { %v3355_v31 = vpop.permute.xlu2 %2376 }
 0x10e   : > { %v2379_v27 = vunpack.i.h.bf16 %v3355_v31  ;;  %v2378_v2 = vunpack.i.l.bf16 %v3355_v31 }
 0x110   : > { %v748_v21 = vrot.slane %v2379_v27, 4  ;;  %v692_v59 = vrot.slane %v2378_v2, 4 }
 0x112   : > { %2501 = vrot.lane.b32.xlu1 %v2500_v47, %s2847_s17 }
 0x113   : > { %2511 = vrot.lane.b32.xlu2 %v2510_v56, %s2848_s19  ;;  %2506 = vrot.lane.b32.xlu0 %v2505_v44, %s2849_s20  ;;  %v989_v56 = vsel %vm263_vm3, 0.0, %v988_v15  ;;  %v484_v15 = vrot.slane %v2368_v29, 4 }
 0x114   : > { %v2525_v44 = vpack.i.bf16 %v989_v56, %v933_v54 }
 0x115   : > { %v3381_v47 = vpop.permute.xlu2 %2391 }
 0x116   : > { %v2394_v57 = vunpack.i.h.bf16 %v3381_v47  ;;  %v2393_v13 = vunpack.i.l.bf16 %v3381_v47 }
 0x118   : > { %v3437_v31 = vrot.slane %v2394_v57, 4  ;;  %v3441_v54 = vrot.slane %v2393_v13, 4 }
 0x11a   : > { %2516 = vrot.lane.b32.xlu1 %v2515_v41, %s2846_s11 }
 0x11b   : > { %2526 = vrot.lane.b32.xlu2 %v2525_v44, %s2849_s20  ;;  %2521 = vrot.lane.b32.xlu0 %v2520_v42, %s2847_s17 }
 0x11d   : > { %v3400_v36 = vpop.permute.xlu2 %2396 }
 0x11e   : > { %v2399_v43 = vunpack.i.h.bf16 %v3400_v36  ;;  %v2398_v26 = vunpack.i.l.bf16 %v3400_v36 }
 0x120   : > { %v1152_v40 = vrot.slane %v2399_v43, 4 }
 0x122   : > { %2531 = vrot.lane.b32.xlu1 %v2530_v16, %s2848_s19 }
 0x123   : > { %2541 = vrot.lane.b32.xlu2 %v2540_v17, %s2847_s17  ;;  %2546 = vrot.lane.b32.xlu0 %v2545_v7, %s2849_s20 }
 0x124   : > { %v3419_v8 = vpop.permute.xlu1 %2361 }
 0x125   : > { %v3421_v9 = vpop.permute.xlu2 %2411  ;;  %v2357_v11 = vpop.permute.xlu0 %2356  ;;  %v2364_v56 = vunpack.i.h.bf16 %v3419_v8  ;;  %v2363_v41 = vunpack.i.l.bf16 %v3419_v8  ;;  %v1096_v8 = vrot.slane %v2398_v26, 4 }
 0x126   : > { %v2359_v6 = vunpack.i.h.bf16 %v2357_v11  ;;  %v2358_v4 = vunpack.i.l.bf16 %v2357_v11  ;;  %v2414_v60 = vunpack.i.h.bf16 %v3421_v9  ;;  %v4706_v46 = vunpack.i.l.bf16 %v3421_v9 }
 0x127   : > { %v554_v51 = vrot.slane %v2364_v56, 4  ;;  %v498_v55 = vrot.slane %v2363_v41, 4 }
 0x128   : > { %v542_v14 = vrot.slane %v2359_v6, 4  ;;  %v486_v18 = vrot.slane %v2358_v4, 4  ;;  %v541_v44 = vsel %vm263_vm3, %v540_v22, %v2359_v6  ;;  %v485_v49 = vsel %vm263_vm3, %v484_v15, %v2358_v4 }
 0x129   : > { %v3455_v62 = vperm.slane %v541_v44, %v2982_v34  ;;  %v3458_v16 = vperm.slane %v485_v49, %v2982_v34 }
 0x12a   : > { %2536 = vrot.lane.b32.xlu1 %v2535_v35, %s2846_s11  ;;  %v543_v30 = vsel %vm263_vm3, %v2369_v28, %v542_v14  ;;  %v487_v19 = vsel %vm263_vm3, %v2368_v29, %v486_v18  ;;  %v3469_v29 = vrot.slane %v2414_v60, 4  ;;  %v3473_v35 = vrot.slane %v4706_v46, 4 }
 0x12b   : > { %v551_v11 = vperm.slane %v543_v30, %v2982_v34  ;;  %v495_v1 = vperm.slane %v487_v19, %v2982_v34  ;;  %v566_v15 = vrot.slane %v3455_v62, 4 }
 0x12c   : > { %v2387_v45 = vpop.permute.xlu1 %2386 }
 0x12d   : > { %v3433_v53 = vpop.permute.xlu2 %2421  ;;  %v2372_v42 = vpop.permute.xlu0 %2371  ;;  %v2389_v50 = vunpack.i.h.bf16 %v2387_v45  ;;  %v2388_v25 = vunpack.i.l.bf16 %v2387_v45  ;;  %v510_v45 = vrot.slane %v3458_v16, 4 }
 0x12e   : > { %v2374_v48 = vunpack.i.h.bf16 %v2372_v42  ;;  %v2373_v58 = vunpack.i.l.bf16 %v2372_v42 }
 0x12f   : > { %v746_v17 = vrot.slane %v2389_v50, 4  ;;  %v690_v24 = vrot.slane %v2388_v25, 4  ;;  %v693_v63 = vsel %vm263_vm3, %v2388_v25, %v692_v59  ;;  %v749_v7 = vsel %vm263_vm3, %v2389_v50, %v748_v21 }
 0x130   : > { %v555_v12 = vsel %vm263_vm3, %v2374_v48, %v554_v51  ;;  %v496_v6 = vrot.slane %v2373_v58, 4  ;;  %v499_v4 = vsel %vm263_vm3, %v2373_v58, %v498_v55  ;;  %v3481_v21 = vperm.slane %v693_v63, %v2982_v34 }
 0x131   : > { %v3484_v59 = vperm.slane %v749_v7, %v2982_v34  ;;  %v691_v18 = vsel %vm263_vm3, %v690_v24, %v2378_v2  ;;  %v747_v42 = vsel %vm263_vm3, %v746_v17, %v2379_v27  ;;  %v552_v44 = vrot.slane %v2374_v48, 4 }
 0x132   : > { %v563_v49 = vperm.slane %v555_v12, %v2982_v34  ;;  %v578_v50 = vrot.slane %v551_v11, 4  ;;  %v522_v25 = vrot.slane %v495_v1, 4  ;;  %v507_v30 = vperm.slane %v499_v4, %v2982_v34 }
 0x133   : > { %v497_v55 = vsel %vm263_vm3, %v496_v6, %v2363_v41  ;;  %v3494_v7 = vperm.slane %v691_v18, %v2982_v34  ;;  %v728_v27 = vrot.slane %v3481_v21, 4  ;;  %v3498_v2 = vperm.slane %v747_v42, %v2982_v34 }
 0x134   : > { %v2407_v28 = vpop.permute.xlu1 %2406  ;;  %v553_v24 = vsel %vm263_vm3, %v552_v44, %v2364_v56  ;;  %v576_v12 = vrot.slane %v563_v49, 4  ;;  %v3503_v10 = vperm.slane %v497_v55, %v2982_v34  ;;  %v523_v6 = vsel %vm263_vm3, %v507_v30, %v522_v25 }
 0x135   : > { %v3476_v22 = vpop.permute.xlu2 %1900  ;;  %v2382_v14 = vpop.permute.xlu0 %2381  ;;  %v2408_v19 = vunpack.i.l.bf16 %v2407_v28  ;;  %v2409_v63 = vunpack.i.h.bf16 %v2407_v28  ;;  %v520_v39 = vrot.slane %v507_v30, 4  ;;  %v716_v56 = vrot.slane %v3494_v7, 4 }
 0x136   : > { %v2384_v48 = vunpack.i.h.bf16 %v2382_v14  ;;  %v2383_v4 = vunpack.i.l.bf16 %v2382_v14  ;;  %v772_v14 = vrot.slane %v3498_v2, 4  ;;  %v3515_v44 = vperm.slane %v553_v24, %v2982_v34 }
 0x137   : > { %v1094_v41 = vrot.slane %v2408_v19, 4  ;;  %v1097_v28 = vsel %vm263_vm3, %v2408_v19, %v1096_v8  ;;  %v1153_v42 = vsel %vm263_vm3, %v2409_v63, %v1152_v40  ;;  %v1150_v55 = vrot.slane %v2409_v63, 4 }
 0x138   : > { %v760_v51 = vrot.slane %v2384_v48, 4  ;;  %v704_v58 = vrot.slane %v2383_v4, 4  ;;  %v3518_v25 = vperm.slane %v1097_v28, %v2982_v34  ;;  %v703_v30 = vsel %vm263_vm3, %v3441_v54, %v2383_v4 }
 0x139   : > { %v3523_v40 = vperm.slane %v523_v6, %v2996_v52  ;;  %v579_v19 = vsel %vm263_vm3, %v563_v49, %v578_v50  ;;  %v1095_v17 = vsel %vm263_vm3, %v1094_v41, %v2398_v26  ;;  %v3530_v24 = vperm.slane %v1153_v42, %v2982_v34 }
 0x13a   : > { %v761_v63 = vsel %vm263_vm3, %v2394_v57, %v760_v51  ;;  %v705_v54 = vsel %vm263_vm3, %v2393_v13, %v704_v58  ;;  %v3539_v4 = vperm.slane %v579_v19, %v2996_v52  ;;  %v521_v49 = vsel %vm263_vm3, %v520_v39, %v495_v1 }
 0x13b   : > { %v577_v50 = vsel %vm263_vm3, %v576_v12, %v551_v11  ;;  %v511_v26 = vsel %vm263_vm3, %v3503_v10, %v510_v45  ;;  %v759_v41 = vsel %vm263_vm3, %v3437_v31, %v2384_v48  ;;  %v3548_v28 = vperm.slane %v703_v30, %v2982_v34 }
 0x13c   : > { %v3507_v18 = vpop.permute.xlu1 %2416  ;;  %v3551_v47 = vperm.slane %v521_v49, %v2996_v52  ;;  %v3554_v57 = vperm.slane %v577_v50, %v2996_v52  ;;  %v1151_v39 = vsel %vm263_vm3, %v1150_v55, %v2399_v43  ;;  %v2560_v13 = vpack.i.bf16 %v3539_v4, %v3523_v40 }
 0x13d   : > { %v3510_v46 = vpop.permute.xlu2 %2441  ;;  %v2402_v8 = vpop.permute.xlu0 %2401  ;;  %v3562_v11 = vperm.slane %v511_v26, %v2996_v52  ;;  %v567_v31 = vsel %vm263_vm3, %v3515_v44, %v566_v15  ;;  %v769_v1 = vperm.slane %v761_v63, %v2982_v34  ;;  %v713_v45 = vperm.slane %v705_v54, %v2982_v34 }
 0x13e   : > { %v2555_v58 = vpack.i.bf16 %v3554_v57, %v3551_v47  ;;  %v3571_v36 = vperm.slane %v567_v31, %v2996_v52  ;;  %v3576_v51 = vperm.slane %v1095_v17, %v2982_v34  ;;  %v3579_v48 = vperm.slane %v759_v41, %v2982_v34  ;;  %2561 = vrot.lane.b32.xlu0 %v2560_v13, %s2843_s8 }
 0x13f   : > { %v2404_v15 = vunpack.i.h.bf16 %v2402_v8  ;;  %v2403_v12 = vunpack.i.l.bf16 %v2402_v8  ;;  %v1132_v42 = vrot.slane %v3518_v25, 4  ;;  %v3586_v55 = vperm.slane %v1151_v39, %v2982_v34 }
 0x140   : > { %4756 = vst [vmem:[#allocation17_spill] sm:$0xff] %v3576_v51  ;;  %2556 = vrot.lane.b32.xlu1 %v2555_v58, %s2844_s9  ;;  %v2550_v17 = vpack.i.bf16 %v3571_v36, %v3562_v11  ;;  %v717_v30 = vsel %vm263_vm3, %v3548_v28, %v716_v56  ;;  %v1188_v63 = vrot.slane %v3530_v24, 4  ;;  %v782_v50 = vrot.slane %v769_v1, 4 }
 0x141   : > { %4757 = vst [vmem:[#allocation18_spill] sm:$0xff] %v3586_v55  ;;  %v1163_v8 = vsel %vm263_vm3, %v3469_v29, %v2404_v15  ;;  %v1164_v54 = vrot.slane %v2404_v15, 4  ;;  %v1107_v49 = vsel %vm263_vm3, %v3473_v35, %v2403_v12  ;;  %v726_v26 = vrot.slane %v713_v45, 4 }
 0x142   : > { %2551 = vrot.lane.b32.xlu2 %v2550_v17, %s2845_s10  ;;  %v1108_v41 = vrot.slane %v2403_v12, 4  ;;  %v3602_v39 = vperm.slane %v717_v30, %v2996_v52  ;;  %v773_v13 = vsel %vm263_vm3, %v3579_v48, %v772_v14  ;;  %v729_v29 = vsel %vm263_vm3, %v713_v45, %v728_v27 }
 0x143   : > { %v1165_v56 = vsel %vm263_vm3, %v2414_v60, %v1164_v54  ;;  %v4758_v35 = vrot.slane %v3484_v59, 4  ;;  %v3616_v58 = vperm.slane %v1163_v8, %v2982_v34  ;;  %v4759_v12 = vunpack.i.l.bf16 %v3421_v9 }
 0x144   : > { %v3573_v43 = vpop.permute.xlu1 %1898  ;;  %v1173_v15 = vperm.slane %v1165_v56, %v2982_v34  ;;  %v3623_v17 = vperm.slane %v1107_v49, %v2982_v34  ;;  %v3627_v27 = vperm.slane %v773_v13, %v2996_v52  ;;  %v3630_v45 = vperm.slane %v729_v29, %v2996_v52 }
 0x145   : > { %v3582_v6 = vpop.permute.xlu2 %1894  ;;  %v3593_v19 = vpop.permute.xlu0 %2426  ;;  %v785_v31 = vsel %vm263_vm3, %v769_v1, %v4758_v35  ;;  %v1109_v60 = vsel %vm263_vm3, %v4759_v12, %v1108_v41  ;;  %v1120_v30 = vrot.slane %v3576_v51, 4  ;;  %v1176_v9 = vrot.slane %v3586_v55, 4 }
 0x146   : > { %v1117_v14 = vperm.slane %v1109_v60, %v2982_v34  ;;  %v3633_v1 = vperm.slane %v785_v31, %v2996_v52  ;;  %v727_v8 = vsel %vm263_vm3, %v726_v26, %v3481_v21  ;;  %v783_v54 = vsel %vm263_vm3, %v782_v50, %v3484_v59 }
 0x147   : > { %v2565_v56 = vpack.i.bf16 %v3627_v27, %v3602_v39  ;;  %v3648_v29 = vperm.slane %v727_v8, %v2996_v52  ;;  %v4760_v31 = vunpack.i.h.bf16 %v3433_v53  ;;  %v4761_v21 = vunpack.i.l.bf16 %v3433_v53 }
 0x148   : > { %v1130_v41 = vrot.slane %v1117_v14, 4  ;;  %v2575_v13 = vpack.i.bf16 %v3633_v1, %v3630_v45  ;;  %v1186_v59 = vrot.slane %v1173_v15, 4  ;;  %v3655_v50 = vperm.slane %v783_v54, %v2996_v52 }
 0x149   : > { %v1312_v12 = vrot.slane %v4760_v31, 4  ;;  %v1314_v26 = vrot.slane %v4761_v21, 4  ;;  %2566 = vrot.lane.b32.xlu1 %v2565_v56, %s2845_s10  ;;  %v1121_v0 = vsel %vm263_vm3, %v3623_v17, %v1120_v30  ;;  %v1177_v8 = vsel %vm263_vm3, %v3616_v58, %v1176_v9 }
 0x14a   : > { %4762 = vst [vmem:[#allocation19_spill] sm:$0xff] %v3655_v50  ;;  %v1133_v3 = vsel %vm263_vm3, %v1117_v14, %v1132_v42  ;;  %v1189_v31 = vsel %vm263_vm3, %v1173_v15, %v1188_v63  ;;  %v4712_v21 = vunpack.i.h.bf16 %v3510_v46  ;;  %v2443_v37 = vunpack.i.l.bf16 %v3510_v46  ;;  %2576 = vrot.lane.b32.xlu2 %v2575_v13, %s2843_s8 }
 0x14b   : > { %v2570_v54 = vpack.i.bf16 %v3655_v50, %v3648_v29  ;;  %v3672_v56 = vperm.slane %v1121_v0, %v2996_v52  ;;  %v3675_v30 = vperm.slane %v1177_v8, %v2996_v52  ;;  %v3678_v9 = vperm.slane %v1133_v3, %v2996_v52 }
 0x14c   : > { %v3641_v49 = vpop.permute.xlu1 %2436  ;;  %v3681_v42 = vperm.slane %v1189_v31, %v2996_v52  ;;  %v1131_v63 = vsel %vm263_vm3, %v1130_v41, %v3518_v25  ;;  %v1187_v0 = vsel %vm263_vm3, %v1186_v59, %v3530_v24  ;;  %v4769_v31 = vunpack.i.l.bf16 %v3433_v53 }
 0x14d   : > { %v2452_v35 = vpop.permute.xlu2 %2451  ;;  %v3657_v60 = vpop.permute.xlu0 %2431  ;;  %4763 = vst [vmem:[#allocation20_spill] sm:$0xff] %v3672_v56  ;;  %2571 = vrot.lane.b32.xlu0 %v2570_v54, %s2844_s9  ;;  %v3687_v15 = vperm.slane %v1131_v63, %v2996_v52  ;;  %v2438_v14 = vunpack.i.l.bf16 %v3641_v49  ;;  %v3693_v13 = vperm.slane %v1187_v0, %v2996_v52  ;;  %v2439_v3 = vunpack.i.h.bf16 %v3641_v49 }
 0x14e   : > { %4764 = vst [vmem:[#allocation21_spill] sm:$0xff] %v3675_v30  ;;  %v2454_v8 = vunpack.i.h.bf16 %v2452_v35  ;;  %v1313_v25 = vsel %vm263_vm3, %v1312_v12, %v4769_v31  ;;  %v4770_v41 = vunpack.i.h.bf16 %v3433_v53  ;;  %v2590_v63 = vpack.i.bf16 %v3681_v42, %v3678_v9 }
 0x14f   : > { %4765 = vst [vmem:[#allocation22_spill] sm:$0xff] %v3678_v9  ;;  %v1760_v59 = vrot.slane %v4712_v21, 4  ;;  %v1704_v0 = vrot.slane %v2443_v37, 4  ;;  %v2428_v49 = vunpack.i.l.bf16 %v3593_v19  ;;  %v2580_v38 = vpack.i.bf16 %v3675_v30, %v3672_v56 }
 0x150   : > { %4766 = vst [vmem:[#allocation23_spill] sm:$0xff] %v3681_v42  ;;  %v1315_v54 = vsel %vm263_vm3, %v4770_v41, %v1314_v26  ;;  %v2429_v53 = vunpack.i.h.bf16 %v3593_v19  ;;  %v2585_v12 = vpack.i.bf16 %v3693_v13, %v3687_v15  ;;  %v1718_v26 = vrot.slane %v2438_v14, 4 }
 0x151   : > { %4767 = vst [vmem:[#allocation24_spill] sm:$0xff] %v3687_v15  ;;  %v2453_v31 = vunpack.i.l.bf16 %v2452_v35  ;;  %2581 = vrot.lane.b32.xlu1 %v2580_v38, %s2845_s10  ;;  %v1774_v21 = vrot.slane %v2439_v3, 4  ;;  %v1761_v61 = vsel %vm263_vm3, %v1760_v59, %v2454_v8  ;;  %v3721_v32 = vperm.slane %v1313_v25, %v2982_v34 }
 0x152   : > { %4768 = vst [vmem:[#allocation25_spill] sm:$0xff] %v3693_v13  ;;  %v3724_v5 = vperm.slane %v1315_v54, %v2982_v34  ;;  %2591 = vrot.lane.b32.xlu2 %v2590_v63, %s2843_s8  ;;  %v2419_v13 = vunpack.i.h.bf16 %v3507_v18  ;;  %v1716_v15 = vrot.slane %v2428_v49, 4  ;;  %v1772_v42 = vrot.slane %v2429_v53, 4 }
 0x153   : > { %v1705_v19 = vsel %vm263_vm3, %v1704_v0, %v2453_v31  ;;  %v1719_v25 = vsel %vm263_vm3, %v2428_v49, %v1718_v26  ;;  %v1706_v59 = vrot.slane %v2453_v31, 4  ;;  %v3736_v54 = vperm.slane %v1761_v61, %v2982_v34 }
 0x154   : > { %v3704_v24 = vpop.permute.xlu1 %1892  ;;  %v3731_v38 = vperm.slane %v1705_v19, %v2982_v34  ;;  %v1717_v63 = vsel %vm263_vm3, %v1716_v15, %v2438_v14  ;;  %v1775_v0 = vsel %vm263_vm3, %v2429_v53, %v1774_v21  ;;  %v1762_v9 = vrot.slane %v2454_v8, 4 }
 0x155   : > { %v3711_v33 = vpop.permute.xlu2 %2461  ;;  %v3716_v41 = vpop.permute.xlu0 %1890  ;;  %2586 = vrot.lane.b32.xlu0 %v2585_v12, %s2844_s9  ;;  %4772 = vst [vmem:[#allocation27_spill] sm:$0xff] %v3736_v54  ;;  %v2433_v35 = vunpack.i.l.bf16 %v3657_v60  ;;  %v1978_v19 = vrot.slane %v3476_v22, 4  ;;  %v2434_v12 = vunpack.i.h.bf16 %v3657_v60  ;;  %v1358_v26 = vrot.slane %v2419_v13, 4 }
 0x156   : > { %4771 = vst [vmem:[#allocation26_spill] sm:$0xff] %v3731_v38  ;;  %v1730_v56 = vrot.slane %v3731_v38, 4  ;;  %v4773_v61 = vunpack.i.l.bf16 %v3507_v18  ;;  %v3748_v15 = vperm.slane %v1719_v25, %v2982_v34  ;;  %v1773_v21 = vsel %vm263_vm3, %v1772_v42, %v2439_v3 }
 0x157   : > { %v3754_v8 = vperm.slane %v1717_v63, %v2982_v34  ;;  %v3757_v53 = vperm.slane %v1775_v0, %v2982_v34  ;;  %v1707_v60 = vsel %vm263_vm3, %v2443_v37, %v1706_v59  ;;  %v1786_v30 = vrot.slane %v3736_v54, 4 }
 0x158   : > { %v1302_v31 = vrot.slane %v4773_v61, 4  ;;  %v1922_v61 = vrot.slane %v3573_v43, 4  ;;  %v1910_v25 = vrot.slane %v3582_v6, 4  ;;  %v4776_v42 = vunpack.i.h.bf16 %v3510_v46 }
 0x159   : > { %4775 = vst [vmem:[#allocation29_spill] sm:$0xff] %v3754_v8  ;;  %v3769_v63 = vperm.slane %v1773_v21, %v2982_v34  ;;  %v1370_v0 = vrot.slane %v2434_v12, 4  ;;  %v1979_v37 = vsel %vm263_vm3, %v1978_v19, %v3704_v24  ;;  %v1731_v59 = vsel %vm263_vm3, %v3754_v8, %v1730_v56 }
 0x15a   : > { %v1763_v3 = vsel %vm263_vm3, %v4776_v42, %v1762_v9  ;;  %v3777_v55 = vperm.slane %v1707_v60, %v2982_v34  ;;  %v1980_v46 = vrot.slane %v3704_v24, 4  ;;  %v3781_v9 = vperm.slane %v1731_v59, %v2996_v52 }
 0x15b   : > { %4777 = vst [vmem:[#allocation30_spill] sm:$0xff] %v3769_v63  ;;  %v3785_v42 = vperm.slane %v1763_v3, %v2982_v34  ;;  %v1787_v19 = vsel %vm263_vm3, %v3769_v63, %v1786_v30  ;;  %v3791_v54 = vperm.slane %v1979_v37, %v2982_v34  ;;  %v1371_v59 = vsel %vm263_vm3, %v2433_v35, %v1370_v0 }
 0x15c   : > { %v2447_v49 = vpop.permute.xlu1 %2446  ;;  %v3794_v60 = vperm.slane %v1787_v19, %v2996_v52  ;;  %v1924_v21 = vrot.slane %v3716_v41, 4  ;;  %v3812_v30 = vperm.slane %v1371_v59, %v2982_v34 }
 0x15d   : > { %v3751_v14 = vpop.permute.xlu2 %2471  ;;  %v3761_v38 = vpop.permute.xlu0 %1896  ;;  %v2449_v51 = vunpack.i.h.bf16 %v2447_v49  ;;  %v2448_v24 = vunpack.i.l.bf16 %v2447_v49 }
 0x15e   : > { %4774 = vst [vmem:[#allocation28_spill] sm:$0xff] %v3751_v14  ;;  %v1368_v14 = vrot.slane %v2433_v35, 4  ;;  %v1966_v3 = vrot.slane %v3761_v38, 4  ;;  %v1923_v35 = vsel %vm263_vm3, %v1922_v61, %v3716_v41 }
 0x15f   : > { %4778 = vst [vmem:[#allocation31_spill] sm:$0xff] %v3794_v60  ;;  %v1356_v8 = vrot.slane %v2449_v51, 4  ;;  %v1300_v37 = vrot.slane %v2448_v24, 4  ;;  %v1303_v59 = vsel %vm263_vm3, %v2448_v24, %v1302_v31 }
 0x160   : > { %v1369_v56 = vsel %vm263_vm3, %v1368_v14, %v2434_v12  ;;  %v1981_v12 = vsel %vm263_vm3, %v3476_v22, %v1980_v46  ;;  %v2595_v14 = vpack.i.bf16 %v3794_v60, %v3781_v9  ;;  %v4779_v22 = vunpack.i.l.bf16 %v3507_v18 }
 0x161   : > { %v3805_v19 = vperm.slane %v1369_v56, %v2982_v34  ;;  %v1357_v49 = vsel %vm263_vm3, %v1356_v8, %v2419_v13  ;;  %v3825_v13 = vperm.slane %v1981_v12, %v2982_v34  ;;  %v1925_v8 = vsel %vm263_vm3, %v3573_v43, %v1924_v21 }
 0x162   : > { %2596 = vrot.lane.b32.xlu0 %v2595_v14, %s2845_s10  ;;  %v1301_v46 = vsel %vm263_vm3, %v1300_v37, %v4779_v22  ;;  %v3819_v56 = vperm.slane %v1357_v49, %v2982_v34  ;;  %v3841_v43 = vperm.slane %v1923_v35, %v2982_v34  ;;  %v3854_v24 = vperm.slane %v1303_v59, %v2982_v34 }
 0x163   : > { %v3830_v61 = vperm.slane %v1301_v46, %v2982_v34 }
 0x164   : > { %v1889_v50 = vpop.permute.xlu1 %1888  ;;  %v1382_v14 = vrot.slane %v3819_v56, 4 }
 0x165   : > { %v1967_v0 = vsel %vm263_vm3, %v1966_v3, %v1889_v50  ;;  %v1887_v63 = vpop.permute.xlu0 %1886  ;;  %v2497_v41 = vpop.permute.xlu2 %2496  ;;  %v1359_v3 = vsel %vm263_vm3, %v2449_v51, %v1358_v26  ;;  %v1968_v37 = vrot.slane %v1889_v50, 4  ;;  %v1326_v49 = vrot.slane %v3830_v61, 4 }
 0x166   : > { %v3822_v60 = vperm.slane %v1967_v0, %v2982_v34  ;;  %v1911_v18 = vsel %vm263_vm3, %v1910_v25, %v1887_v63  ;;  %v1912_v0 = vrot.slane %v1887_v63, 4  ;;  %v2499_v22 = vunpack.i.h.bf16 %v2497_v41 }
 0x167   : > { %v3838_v12 = vperm.slane %v1911_v18, %v2982_v34  ;;  %v1383_v31 = vsel %vm263_vm3, %v3805_v19, %v1382_v14  ;;  %v1392_v51 = vrot.slane %v3812_v30, 4  ;;  %v3848_v50 = vperm.slane %v1359_v3, %v2982_v34 }
 0x168   : > { %4780 = vst [vmem:[#allocation32_spill] sm:$0xff] %v3822_v60  ;;  %v1992_v21 = vrot.slane %v3822_v60, 4  ;;  %v2498_v25 = vunpack.i.l.bf16 %v2497_v41  ;;  %v1969_v35 = vsel %vm263_vm3, %v3761_v38, %v1968_v37  ;;  %v1327_v46 = vsel %vm263_vm3, %v3721_v32, %v1326_v49 }
 0x169   : > { %v1936_v26 = vrot.slane %v3838_v12, 4  ;;  %v3861_v18 = vperm.slane %v1383_v31, %v2996_v52  ;;  %v1913_v3 = vsel %vm263_vm3, %v3582_v6, %v1912_v0  ;;  %v445_v41 = vsel %vm431_vm4, %v3305_v23, %v2499_v22 }
 0x16a   : > { %v3868_v14 = vperm.slane %v1327_v46, %v2996_v52  ;;  %v1993_v37 = vsel %vm263_vm3, %v3791_v54, %v1992_v21  ;;  %v432_v49 = vsel %vm431_vm4, %v3301_v20, %v2498_v25  ;;  %v3885_v22 = vperm.slane %v1969_v35, %v2982_v34 }
 0x16b   : > { %v1937_v38 = vsel %vm263_vm3, %v3841_v43, %v1936_v26  ;;  %v3882_v0 = vperm.slane %v1993_v37, %v2996_v52  ;;  %v4782_v20 = vrot.slane %v3724_v5, 4  ;;  %v1798_v25 = vrot.slane %v3785_v42, 4 }
 0x16c   : > { %v3851_v63 = vpop.permute.xlu1 %2466  ;;  %v2600_v6 = vpack.i.bf16 %v3861_v18, %v3868_v14  ;;  %v3879_v23 = vperm.slane %v1937_v38, %v2996_v52  ;;  %v1393_v35 = vsel %vm263_vm3, %v1392_v51, %v3848_v50  ;;  %v2002_v46 = vrot.slane %v3825_v13, 4 }
 0x16d   : > { %4781 = vst [vmem:[#allocation33_spill] sm:$0xff] %v3851_v63  ;;  %v2457_v59 = vpop.permute.xlu0 %2456  ;;  %v1337_v26 = vsel %vm263_vm3, %v4782_v20, %v3854_v24  ;;  %2055 = vrot.lane.b32.xlu1 %v3882_v0, %s2845_s10  ;;  %v4784_v38 = vrot.slane %v3757_v53, 4  ;;  %v714_v51 = vrot.slane %v3548_v28, 4  ;;  %v3923_v20 = vperm.slane %v1393_v35, %v2996_v52 }
 0x16e   : > { %v2459_v63 = vunpack.i.h.bf16 %v2457_v59  ;;  %v2458_v60 = vunpack.i.l.bf16 %v2457_v59  ;;  %2601 = vrot.lane.b32.xlu2 %v2600_v6, %s2845_s10  ;;  %2027 = vrot.lane.b32.xlu0 %v3879_v23, %s2845_s10  ;;  %v1921_v59 = vperm.slane %v1913_v3, %v2982_v34  ;;  %v3920_v6 = vperm.slane %v1337_v26, %v2996_v52 }
 0x16f   : > { %v1797_v37 = vsel %vm263_vm3, %v4784_v38, %v3785_v42  ;;  %v4786_v42 = vrot.slane %v3777_v55, 4  ;;  %v508_v26 = vrot.slane %v3503_v10, 4 }
 0x170   : > { %v3888_v31 = vsel %vm433_vm5, %v432_v49, %v2458_v60  ;;  %v3891_v21 = vsel %vm433_vm5, %v445_v41, %v2459_v63  ;;  %v4783_v60 = vrot.slane %v3748_v15, 4  ;;  %v1933_v41 = vperm.slane %v1925_v8, %v2982_v34 }
 0x171   : > { %v2003_v34 = vsel %vm263_vm3, %v2002_v46, %v3885_v22  ;;  %v3931_v3 = vperm.slane %v1797_v37, %v2996_v52  ;;  %v1743_v28 = vsel %vm263_vm3, %v3748_v15, %v4786_v42  ;;  %v1799_v46 = vsel %vm263_vm3, %v3757_v53, %v1798_v25 }
 0x172   : > { %v1741_v63 = vsel %vm263_vm3, %v4783_v60, %v3777_v55  ;;  %v770_v60 = vrot.slane %v3579_v48, 4  ;;  %v1946_v37 = vrot.slane %v1933_v41, 4  ;;  %v3946_v55 = vperm.slane %v2003_v34, %v2996_v52 }
 0x173   : > { %v3928_v8 = vperm.slane %v1741_v63, %v2996_v52  ;;  %v564_v63 = vrot.slane %v3515_v44, 4  ;;  %v2610_v15 = vpack.i.bf16 %v3923_v20, %v3920_v6  ;;  %v3951_v10 = vperm.slane %v1743_v28, %v2996_v52 }
 0x174   : > { %v3917_v49 = vpop.permute.xlu1 %2476  ;;  %v534_v48 = vrot.slane %v3562_v11, 4  ;;  %v3957_v44 = vperm.slane %v1799_v46, %v2996_v52  ;;  %v590_v25 = vrot.slane %v3571_v36, 4  ;;  %v715_v34 = vsel %vm263_vm3, %v714_v51, %v3494_v7 }
 0x175   : > { %4785 = vst [vmem:[#allocation34_spill] sm:$0xff] %v3917_v49  ;;  %v3939_v35 = vpop.permute.xlu0 %2481  ;;  %v1948_v49 = vrot.slane %v1921_v59, 4  ;;  %v2605_v53 = vpack.i.bf16 %v3931_v3, %v3928_v8  ;;  %v3966_v42 = vperm.slane %v715_v34, %v2996_v52  ;;  %v771_v11 = vsel %vm263_vm3, %v770_v60, %v3498_v2 }
 0x176   : > { %4787 = vst [vmem:[#allocation35_spill] sm:$0xff] %v3939_v35  ;;  %2063 = vrot.lane.b32.xlu2 %v3946_v55, %s2844_s9  ;;  %2611 = vrot.lane.b32.xlu0 %v2610_v15, %s2844_s9  ;;  %v509_v28 = vsel %vm263_vm3, %v508_v26, %v3458_v16  ;;  %v536_v46 = vrot.slane %v3551_v47, 4  ;;  %v1947_v7 = vsel %vm263_vm3, %v1946_v37, %v1921_v59  ;;  %v1118_v2 = vrot.slane %v3623_v17, 4 }
 0x177   : > { %4788 = vst [vmem:[#allocation36_spill] sm:$0xff] %v3966_v42  ;;  %2606 = vrot.lane.b32.xlu1 %v2605_v53, %s2844_s9  ;;  %v3976_v36 = vperm.slane %v771_v11, %v2996_v52  ;;  %v3979_v51 = vperm.slane %v509_v28, %v2996_v52  ;;  %v565_v15 = vsel %vm263_vm3, %v564_v63, %v3455_v62  ;;  %v738_v16 = vrot.slane %v3966_v42, 4  ;;  %v4796_v42 = vld [vmem:[#allocation17_spill] sm:$0xff] }
 0x178   : > { %v3988_v47 = vperm.slane %v565_v15, %v2996_v52  ;;  %v592_v59 = vrot.slane %v3554_v57, 4  ;;  %v2464_v26 = vunpack.i.h.bf16 %v3711_v33  ;;  %v535_v37 = vsel %vm263_vm3, 0.0, %v534_v48 }
 0x179   : > { %4789 = vst [vmem:[#allocation37_spill] sm:$0xff] %v3976_v36  ;;  %v591_v53 = vsel %vm263_vm3, 0.0, %v590_v25  ;;  %v744_v34 = vrot.slane %v3630_v45, 4  ;;  %v2615_v62 = vpack.i.bf16 %v3957_v44, %v3951_v10  ;;  %v4000_v63 = vperm.slane %v1947_v7, %v2996_v52 }
 0x17a   : > { %4790 = vst [vmem:[#allocation38_spill] sm:$0xff] %v3979_v51  ;;  %v794_v11 = vrot.slane %v3976_v36, 4  ;;  %v4004_v57 = vsel %vm263_vm3, 0.0, %v536_v46  ;;  %v1949_v28 = vsel %vm263_vm3, %v1933_v41, %v1948_v49  ;;  %v532_v48 = vrot.slane %v3979_v51, 4  ;;  %v4795_v51 = vld [vmem:[#allocation19_spill] sm:$0xff] }
 0x17b   : > { %4792 = vst [vmem:[#allocation40_spill] sm:$0xff] %v3988_v47  ;;  %v588_v45 = vrot.slane %v3988_v47, 4  ;;  %v2625_v25 = vpack.i.bf16 %v591_v53, %v535_v37  ;;  %v739_v15 = vsel %vm263_vm3, 0.0, %v738_v16  ;;  %v4011_v38 = vsel %vm263_vm3, 0.0, %v592_v59 }
 0x17c   : > { %v3984_v60 = vpop.permute.xlu1 %2491  ;;  %4793 = vst [vmem:[#allocation41_spill] sm:$0xff] %v4000_v63  ;;  %v4016_v46 = vsel %vm263_vm3, 0.0, %v744_v34  ;;  %v800_v41 = vrot.slane %v3633_v1, 4  ;;  %v538_v49 = vrot.slane %v3523_v40, 4  ;;  %v795_v37 = vsel %vm263_vm3, 0.0, %v794_v11 }
 0x17d   : > { %4791 = vst [vmem:[#allocation39_spill] sm:$0xff] %v3984_v60  ;;  %v3997_v17 = vpop.permute.xlu0 %2486  ;;  %v594_v16 = vrot.slane %v3539_v4, 4  ;;  %v740_v59 = vrot.slane %v3602_v39, 4  ;;  %v796_v53 = vrot.slane %v3627_v27, 4  ;;  %v533_v34 = vsel %vm263_vm3, 0.0, %v532_v48 }
 0x17e   : > { %2616 = vrot.lane.b32.xlu2 %v2615_v62, %s2843_s8  ;;  %2626 = vrot.lane.b32.xlu0 %v2625_v25, %s2847_s17  ;;  %v589_v1 = vsel %vm263_vm3, 0.0, %v588_v45  ;;  %v4031_v40 = vsel %vm263_vm3, 0.0, %v800_v41  ;;  %v4034_v62 = vsel %vm263_vm3, 0.0, %v538_v49  ;;  %v4047_v45 = vpop.permute.xlu2 %2511  ;;  %v2463_v4 = vunpack.i.l.bf16 %v3711_v33 }
 0x17f   : > { %2035 = vrot.lane.b32.xlu1 %v4000_v63, %s2844_s9  ;;  %v4039_v39 = vsel %vm263_vm3, 0.0, %v594_v16  ;;  %v4042_v27 = vsel %vm263_vm3, 0.0, %v740_v59  ;;  %v4045_v48 = vsel %vm263_vm3, 0.0, %v796_v53  ;;  %v4055_v16 = vperm.slane %v1949_v28, %v2996_v52  ;;  %s2202_s9 = sshll.u32 %s2198_s23, 4  ;;  %s2203_s9 = int_to_ptr.hbm [resolvable:$true] %s2202_s9 }
 0x180   : > { %v2635_v49 = vpack.i.bf16 %v4039_v39, %v4034_v62  ;;  %v742_v53 = vrot.slane %v3648_v29, 4  ;;  %v798_v47 = vrot.slane %v4795_v51, 4  ;;  %v2640_v39 = vpack.i.bf16 %v795_v37, %v739_v15  ;;  %v4797_v29 = vld [vmem:[#allocation18_spill] sm:$0xff]  ;;  %v4799_v15 = vld [vmem:[#allocation20_spill] sm:$0xff]  ;;  %s2781_s10 = sshra.s32 %s2203_s9, 4  ;;  %s2782_s10 = int_to_ptr.hbm [resolvable:$true] %s2781_s10 }
 0x181   : > { %4794 = vst [vmem:[#allocation42_spill] sm:$0xff] %v4055_v16  ;;  %v1119_v7 = vsel %vm263_vm3, %v1118_v2, %v4796_v42  ;;  %v2620_v36 = vpack.i.bf16 %v589_v1, %v533_v34  ;;  %v4798_v51 = vrot.slane %v3616_v58, 4  ;;  %v1144_v42 = vrot.slane %v4799_v15, 4  ;;  %v4800_v2 = vld [vmem:[#allocation21_spill] sm:$0xff]  ;;  %v4801_v34 = vld [vmem:[#allocation22_spill] sm:$0xff]  ;;  %p2788_p0 = scmp.lt.s32.totalorder %s2782_s10, %s4705_s3 }
 0x182   : > { %v1200_v37 = vrot.slane %v4800_v2, 4  ;;  %v1148_v1 = vrot.slane %v4801_v34, 4  ;;  %v4805_v2 = vld [vmem:[#allocation28_spill] sm:$0xff] }
 0x183   : > { %v1175_v60 = vsel %vm263_vm3, %v4798_v51, %v4797_v29  ;;  %v2473_v34 = vunpack.i.l.bf16 %v4805_v2 }
 0x184   : > { %v2502_v11 = vpop.permute.xlu1 %2501  ;;  %v4109_v29 = vsel %vm263_vm3, 0.0, %v1148_v1 }
 0x185   : > { %v2504_v25 = vunpack.i.h.bf16 %v2502_v11  ;;  %v2503_v41 = vunpack.i.l.bf16 %v2502_v11  ;;  %v4057_v59 = vpop.permute.xlu0 %2506 }
 0x186   : > { %2043 = vrot.lane.b32.xlu2 %v4055_v16, %s2843_s8  ;;  %2641 = vrot.lane.b32.xlu0 %v2640_v39, %s2846_s11  ;;  %v4807_v39 = vld [vmem:[#allocation14_spill] sm:$0xff]  ;;  %v4808_v16 = vld [vmem:[#allocation13_spill] sm:$0xff] }
 0x187   : > { %v436_v11 = vsel %vm435_vm6, %v3888_v31, %v2503_v41  ;;  %v447_v62 = vsel %vm435_vm6, %v3891_v21, %v2504_v25  ;;  %v4078_v31 = vsel %vm263_vm3, 0.0, %v742_v53  ;;  %v4081_v21 = vsel %vm263_vm3, 0.0, %v798_v47  ;;  %2621 = vrot.lane.b32.xlu1 %v2620_v36, %s2846_s11 }
 0x188   : > { %v4068_v33 = vsel %vm437_vm7, %v436_v11, %v2463_v4  ;;  %v4071_v28 = vsel %vm437_vm7, %v447_v62, %v2464_v26  ;;  %v4089_v26 = vperm.slane %v1119_v7, %v2996_v52  ;;  %v2650_v58 = vpack.i.bf16 %v4081_v21, %v4078_v31  ;;  %v4802_v4 = vld [vmem:[#allocation23_spill] sm:$0xff]  ;;  %v4803_v7 = vld [vmem:[#allocation24_spill] sm:$0xff] }
 0x189   : > { %v1204_v47 = vrot.slane %v4802_v4, 4  ;;  %v4097_v25 = vperm.slane %v1175_v60, %v2996_v52  ;;  %v4100_v41 = vsel %vm263_vm3, 0.0, %v1144_v42  ;;  %v4103_v53 = vsel %vm263_vm3, 0.0, %v1200_v37  ;;  %v4804_v60 = vld [vmem:[#allocation25_spill] sm:$0xff] }
 0x18a   : > { %v1146_v11 = vrot.slane %v4803_v7, 4  ;;  %v1202_v51 = vrot.slane %v4804_v60, 4  ;;  %v2474_v37 = vunpack.i.h.bf16 %v4805_v2 }
 0x18b   : > { %v4112_v36 = vsel %vm263_vm3, 0.0, %v1204_v47  ;;  %v4125_v47 = vpop.permute.xlu2 %2526 }
 0x18c   : > { %v2517_v62 = vpop.permute.xlu1 %2516  ;;  %v4118_v42 = vsel %vm263_vm3, 0.0, %v1146_v11  ;;  %v4123_v1 = vsel %vm263_vm3, 0.0, %v1202_v51  ;;  %4806 = vst [vmem:[#allocation19_spill] sm:$0xff] %v4125_v47 }
 0x18d   : > { %v2519_v31 = vunpack.i.h.bf16 %v2517_v62  ;;  %v2518_v21 = vunpack.i.l.bf16 %v2517_v62  ;;  %v2522_v4 = vpop.permute.xlu0 %2521  ;;  %v2670_v2 = vpack.i.bf16 %v4123_v1, %v4118_v42 }
 0x18e   : > { %v2524_v7 = vunpack.i.h.bf16 %v2522_v4  ;;  %v2523_v60 = vunpack.i.l.bf16 %v2522_v4  ;;  %v1142_v4 = vrot.slane %v4089_v26, 4 }
 0x18f   : > { %v1055_v62 = vsel %vm431_vm4, %v4807_v39, %v2519_v31  ;;  %v1048_v15 = vsel %vm431_vm4, %v4808_v16, %v2518_v21  ;;  %v1198_v39 = vrot.slane %v4097_v25, 4  ;;  %v4809_v31 = vld [vmem:[#allocation29_spill] sm:$0xff]  ;;  %v4810_v16 = vpack.i.bf16 %v4011_v38, %v4004_v57  ;;  %2636 = vrot.lane.b32.xlu1 %v2635_v49, %s2848_s19  ;;  %v4814_v57 = vld [vmem:[#allocation26_spill] sm:$0xff] }
 0x190   : > { %v1056_v11 = vsel %vm433_vm5, %v1055_v62, %v2474_v37  ;;  %v1049_v35 = vsel %vm433_vm5, %v1048_v15, %v2473_v34  ;;  %v1728_v47 = vrot.slane %v4809_v31, 4  ;;  %v4811_v21 = vpack.i.bf16 %v4031_v40, %v4016_v46  ;;  %v4812_v15 = vld [vmem:[#allocation30_spill] sm:$0xff]  ;;  %v4813_v62 = vld [vmem:[#allocation31_spill] sm:$0xff] }
 0x191   : > { %v4136_v51 = vsel %vm435_vm6, %v1056_v11, %v2524_v7  ;;  %v4139_v63 = vsel %vm435_vm6, %v1049_v35, %v2523_v60  ;;  %2631 = vrot.lane.b32.xlu2 %v4810_v16, %s2849_s20  ;;  %v1784_v37 = vrot.slane %v4812_v15, 4  ;;  %v1754_v35 = vrot.slane %v3781_v9, 4  ;;  %v4815_v40 = vld [vmem:[#allocation27_spill] sm:$0xff] }
 0x192   : > { %2656 = vrot.lane.b32.xlu0 %v4811_v21, %s2848_s19  ;;  %v1143_v7 = vsel %vm263_vm3, 0.0, %v1142_v4  ;;  %v1199_v60 = vsel %vm263_vm3, 0.0, %v1198_v39  ;;  %v1810_v38 = vrot.slane %v4813_v62, 4  ;;  %v1729_v11 = vsel %vm263_vm3, %v1728_v47, %v4814_v57 }
 0x193   : > { %v1324_v46 = vrot.slane %v3721_v32, 4  ;;  %v1785_v31 = vsel %vm263_vm3, %v1784_v37, %v4815_v40  ;;  %v4166_v49 = vsel %vm263_vm3, 0.0, %v1754_v35  ;;  %v1380_v9 = vrot.slane %v3805_v19, 4  ;;  %v2542_v21 = vpop.permute.xlu2 %2541 }
 0x194   : > { %v4155_v34 = vpop.permute.xlu1 %2531  ;;  %v2660_v16 = vpack.i.bf16 %v1199_v60, %v1143_v7  ;;  %v4170_v4 = vperm.slane %v1729_v11, %v2996_v52  ;;  %v4175_v47 = vsel %vm263_vm3, 0.0, %v1810_v38  ;;  %v4816_v32 = vpack.i.bf16 %v4045_v48, %v4042_v27 }
 0x195   : > { %v1325_v39 = vsel %vm263_vm3, %v1324_v46, %v3830_v61  ;;  %v4183_v19 = vperm.slane %v1785_v31, %v2996_v52  ;;  %v1381_v15 = vsel %vm263_vm3, %v1380_v9, %v3819_v56  ;;  %v2690_v37 = vpack.i.bf16 %v4175_v47, %v4166_v49  ;;  %v4817_v46 = vld [vmem:[#allocation16_spill] sm:$0xff]  ;;  %v4818_v31 = vld [vmem:[#allocation15_spill] sm:$0xff]  ;;  %v4825_v49 = vld [vmem:[#allocation41_spill] sm:$0xff] }
 0x196   : > { %v1934_v61 = vrot.slane %v3841_v43, 4  ;;  %v1338_v35 = vrot.slane %v3854_v24, 4  ;;  %v1394_v7 = vrot.slane %v3848_v50, 4  ;;  %v2004_v27 = vrot.slane %v3885_v22, 4 }
 0x197   : > { %2651 = vrot.lane.b32.xlu1 %v2650_v58, %s2849_s20  ;;  %v2544_v48 = vunpack.i.h.bf16 %v2542_v21  ;;  %v2543_v60 = vunpack.i.l.bf16 %v2542_v21  ;;  %v4195_v38 = vperm.slane %v1325_v39, %v2996_v52  ;;  %v2489_v56 = vunpack.i.h.bf16 %v3997_v17 }
 0x198   : > { %v4199_v43 = vperm.slane %v1381_v15, %v2996_v52  ;;  %v2488_v24 = vunpack.i.l.bf16 %v3997_v17  ;;  %v1752_v50 = vrot.slane %v4170_v4, 4  ;;  %v1808_v58 = vrot.slane %v4183_v19, 4 }
 0x199   : > { %2646 = vrot.lane.b32.xlu2 %v4816_v32, %s2847_s17  ;;  %v1935_v22 = vsel %vm263_vm3, %v1934_v61, %v3838_v12  ;;  %v1408_v21 = vrot.slane %v3923_v20, 4  ;;  %v1348_v32 = vrot.slane %v4195_v38, 4  ;;  %v4217_v15 = vsel %vm263_vm3, %v3825_v13, %v2004_v27 }
 0x19a   : > { %2661 = vrot.lane.b32.xlu0 %v2660_v16, %s2846_s11  ;;  %v1352_v16 = vrot.slane %v3920_v6, 4  ;;  %v1404_v6 = vrot.slane %v4199_v43, 4  ;;  %v4820_v13 = vpack.i.bf16 %v4112_v36, %v4109_v29  ;;  %v4238_v27 = vperm.slane %v1935_v22, %v2996_v52 }
 0x19b   : > { %v1990_v29 = vrot.slane %v3791_v54, 4  ;;  %v1753_v36 = vsel %vm263_vm3, 0.0, %v1752_v50  ;;  %v1962_v47 = vrot.slane %v4825_v49, 4 }
 0x19c   : > { %v2537_v62 = vpop.permute.xlu1 %2536  ;;  %v4227_v20 = vsel %vm263_vm3, 0.0, %v1352_v16  ;;  %v1405_v42 = vsel %vm263_vm3, 0.0, %v1404_v6  ;;  %v1406_v16 = vrot.slane %v3861_v18, 4  ;;  %v4292_v6 = vpop.permute.xlu2 %2551  ;;  %v1812_v18 = vrot.slane %v3931_v3, 4 }
 0x19d   : > { %v2539_v57 = vunpack.i.h.bf16 %v2537_v62  ;;  %v2538_v11 = vunpack.i.l.bf16 %v2537_v62  ;;  %v4819_v62 = vpack.i.bf16 %v4103_v53, %v4100_v41 }
 0x19f   : > { %v1665_v40 = vsel %vm431_vm4, %v4817_v46, %v2539_v57  ;;  %v1658_v9 = vsel %vm431_vm4, %v4818_v31, %v2538_v11  ;;  %2671 = vrot.lane.b32.xlu1 %v2670_v2, %s2849_s20  ;;  %v1958_v2 = vrot.slane %v4238_v27, 4 }
 0x1a0   : > { %v1666_v39 = vsel %vm433_vm5, %v1665_v40, %v2489_v56  ;;  %v1659_v17 = vsel %vm433_vm5, %v1658_v9, %v2488_v24  ;;  %v1395_v56 = vsel %vm263_vm3, %v3812_v30, %v1394_v7  ;;  %v1809_v30 = vsel %vm263_vm3, 0.0, %v1808_v58  ;;  %v4821_v7 = vld [vmem:[#allocation32_spill] sm:$0xff] }
 0x1a1   : > { %v4220_v12 = vsel %vm435_vm6, %v1659_v17, %v2543_v60  ;;  %v4223_v61 = vsel %vm435_vm6, %v1666_v39, %v2544_v48  ;;  %2666 = vrot.lane.b32.xlu2 %v4819_v62, %s2847_s17  ;;  %v4241_v48 = vsel %vm263_vm3, 0.0, %v1408_v21  ;;  %v1339_v60 = vsel %vm263_vm3, %v3724_v5, %v1338_v35 }
 0x1a2   : > { %2676 = vrot.lane.b32.xlu0 %v4820_v13, %s2848_s19  ;;  %v2705_v41 = vpack.i.bf16 %v4241_v48, %v4227_v20  ;;  %v4254_v53 = vperm.slane %v1339_v60, %v2996_v52  ;;  %v4259_v5 = vperm.slane %v1395_v56, %v2996_v52  ;;  %v1349_v35 = vsel %vm263_vm3, 0.0, %v1348_v32 }
 0x1a3   : > { %v1991_v57 = vsel %vm263_vm3, %v1990_v29, %v4821_v7  ;;  %v2680_v50 = vpack.i.bf16 %v1809_v30, %v1753_v36  ;;  %v2685_v58 = vpack.i.bf16 %v1405_v42, %v1349_v35  ;;  %v1959_v31 = vsel %vm263_vm3, 0.0, %v1958_v2 }
 0x1a4   : > { %v1354_v1 = vrot.slane %v4254_v53, 4  ;;  %v2715_v54 = vpack.i.bf16 %v4259_v5, %v4254_v53  ;;  %v1410_v11 = vrot.slane %v4259_v5, 4  ;;  %v4278_v46 = vperm.slane %v1991_v57, %v2996_v52 }
 0x1a5   : > { %v1350_v9 = vrot.slane %v3868_v14, 4  ;;  %v2016_v39 = vrot.slane %v3882_v0, 4  ;;  %v1407_v32 = vsel %vm263_vm3, 0.0, %v1406_v16  ;;  %v1756_v62 = vrot.slane %v3928_v8, 4  ;;  %v4822_v0 = vld [vmem:[#allocation33_spill] sm:$0xff]  ;;  %v4823_v16 = vld [vmem:[#allocation34_spill] sm:$0xff] }
 0x1a6   : > { %v4272_v24 = vsel %vm263_vm3, 0.0, %v1354_v1  ;;  %v4275_v22 = vsel %vm263_vm3, 0.0, %v1410_v11  ;;  %v2014_v21 = vrot.slane %v4278_v46, 4  ;;  %v2469_v56 = vunpack.i.h.bf16 %v4822_v0 }
 0x1a7   : > { %v2725_v40 = vpack.i.bf16 %v4275_v22, %v4272_v24  ;;  %2023 = vrot.lane.b32.xlu1 %v1959_v31, %s2846_s11  ;;  %v1351_v17 = vsel %vm263_vm3, 0.0, %v1350_v9  ;;  %v2017_v14 = vsel %vm263_vm3, 0.0, %v2016_v39  ;;  %v2468_v29 = vunpack.i.l.bf16 %v4822_v0 }
 0x1a8   : > { %v2015_v13 = vsel %vm263_vm3, 0.0, %v2014_v21  ;;  %v2695_v60 = vpack.i.bf16 %v1407_v32, %v1351_v17  ;;  %v2514_v36 = vunpack.i.h.bf16 %v4047_v45  ;;  %v2509_v8 = vunpack.i.h.bf16 %v4057_v59  ;;  %v4824_v17 = vld [vmem:[#allocation19_spill] sm:$0xff] }
 0x1a9   : > { %2681 = vrot.lane.b32.xlu2 %v2680_v50, %s2846_s11  ;;  %v2508_v30 = vunpack.i.l.bf16 %v4057_v59  ;;  %v2513_v35 = vunpack.i.l.bf16 %v4047_v45  ;;  %v1757_v3 = vsel %vm263_vm3, 0.0, %v1756_v62  ;;  %v1813_v42 = vsel %vm263_vm3, 0.0, %v1812_v18 }
 0x1aa   : > { %2686 = vrot.lane.b32.xlu0 %v2685_v58, %s2846_s11  ;;  %v2018_v1 = vrot.slane %v3946_v55, 4  ;;  %v449_v7 = vsel %vm439_vm8, %v4071_v28, %v2509_v8  ;;  %v2700_v45 = vpack.i.bf16 %v1813_v42, %v1757_v3  ;;  %v2547_v55 = vpop.permute.xlu0 %2546  ;;  %v4322_v58 = vpop.permute.xlu2 %2576  ;;  %v1758_v28 = vrot.slane %v3951_v10, 4 }
 0x1ab   : > { %v440_v2 = vsel %vm439_vm8, %v4068_v33, %v2508_v30  ;;  %v450_v59 = vsel %vm441_vm9, %v449_v7, %v2469_v56  ;;  %v1814_v31 = vrot.slane %v3957_v44, 4  ;;  %v1960_v9 = vrot.slane %v3879_v23, 4 }
 0x1ac   : > { %v442_v57 = vsel %vm441_vm9, %v440_v2, %v2468_v29  ;;  %v4320_v50 = vsel %vm443_vm10, %v450_v59, %v2514_v36  ;;  %v2019_v33 = vsel %vm263_vm3, 0.0, %v2018_v1  ;;  %v2479_v21 = vunpack.i.h.bf16 %v4823_v16  ;;  %v4827_v59 = vld [vmem:[#allocation39_spill] sm:$0xff] }
 0x1ad   : > { %v4317_v11 = vsel %vm443_vm10, %v442_v57, %v2513_v35  ;;  %v2478_v39 = vunpack.i.l.bf16 %v4823_v16  ;;  %v2529_v32 = vunpack.i.h.bf16 %v4824_v17  ;;  %v1759_v10 = vsel %vm263_vm3, 0.0, %v1758_v28  ;;  %v4830_v16 = vld [vmem:[#allocation9_spill] sm:$0xff] }
 0x1ae   : > { %v1815_v44 = vsel %vm263_vm3, 0.0, %v1814_v31  ;;  %v2534_v23 = vunpack.i.h.bf16 %v4155_v34  ;;  %v1058_v18 = vsel %vm437_vm7, %v4136_v51, %v2479_v21  ;;  %v2533_v0 = vunpack.i.l.bf16 %v4155_v34 }
 0x1af   : > { %2696 = vrot.lane.b32.xlu1 %v2695_v60, %s2847_s17  ;;  %v1051_v60 = vsel %vm437_vm7, %v4139_v63, %v2478_v39  ;;  %v1961_v56 = vsel %vm263_vm3, 0.0, %v1960_v9  ;;  %v1059_v36 = vsel %vm439_vm8, %v1058_v18, %v2529_v32  ;;  %v1963_v8 = vsel %vm263_vm3, 0.0, %v1962_v47  ;;  %v4833_v32 = vld [vmem:[#allocation11_spill] sm:$0xff] }
 0x1b0   : > { %v2710_v30 = vpack.i.bf16 %v1815_v44, %v1759_v10  ;;  %v2013_v1 = vperm.slane %v4217_v15, %v2996_v52  ;;  %v2494_v52 = vunpack.i.h.bf16 %v4827_v59  ;;  %v2493_v15 = vunpack.i.l.bf16 %v4827_v59 }
 0x1b1   : > { %2051 = vrot.lane.b32.xlu2 %v2015_v13, %s2846_s11  ;;  %v2528_v13 = vunpack.i.l.bf16 %v4824_v17  ;;  %v2549_v28 = vunpack.i.h.bf16 %v2547_v55  ;;  %v2548_v31 = vunpack.i.l.bf16 %v2547_v55  ;;  %v4832_v17 = vld [vmem:[#allocation12_spill] sm:$0xff]  ;;  %v2554_v18 = vunpack.i.h.bf16 %v4292_v6  ;;  %s2783_s11 = scalar_lea.hbm %s2782_s10, 16 }
 0x1b2   : > { %2059 = vrot.lane.b32.xlu0 %v2017_v14, %s2847_s17  ;;  %v4355_v42 = vpop.permute.xlu0 %2561  ;;  %v4360_v63 = vpop.permute.xlu2 %2591  ;;  %v2020_v9 = vrot.slane %v2013_v1, 4  ;;  %v1661_v20 = vsel %vm437_vm7, %v4220_v12, %v2493_v15  ;;  %v1668_v48 = vsel %vm437_vm7, %v4223_v61, %v2494_v52  ;;  %v4834_v49 = vpack.i.bf16 %v4832_v17, %v4833_v32  ;;  %p2784_p6 = scmp.ne.s32.totalorder %s2782_s10, %s2783_s11 }
 0x1b3   : > { %v1052_v29 = vsel %vm439_vm8, %v1051_v60, %v2528_v13  ;;  %v4370_v2 = vpop.permute.xlu1 %2556  ;;  %v4396_v53 = vsel %vm439_vm8, %v1668_v48, %v2549_v28 }
 0x1b4   : > { %v2021_v12 = vsel %vm263_vm3, 0.0, %v2020_v9  ;;  %v4835_v9 = vld [vmem:[#allocation37_spill] sm:$0xff]  ;;  %p2785_p9 = pnand %p2784_p6, %p2921_p11 }
 0x1b6   : > { %p2786_p13 = pneg %p2785_p9 }
 0x1b7   : > { %2067 = vrot.lane.b32.xlu1 %v2019_v33, %s2849_s20 }
 0x1b9   : > { %2691 = vrot.lane.b32.xlu2 %v2690_v37, %s2847_s17  ;;  %v4826_v37 = vld [vmem:[#allocation35_spill] sm:$0xff] }
 0x1ba   : > { %2701 = vrot.lane.b32.xlu0 %v2700_v45, %s2849_s20  ;;  %v2484_v62 = vunpack.i.h.bf16 %v4826_v37  ;;  %v2483_v14 = vunpack.i.l.bf16 %v4826_v37  ;;  %v4828_v45 = vld [vmem:[#allocation42_spill] sm:$0xff] }
 0x1bb   : > { %v1964_v33 = vrot.slane %v4828_v45, 4  ;;  %v2567_v55 = vpop.permute.xlu1 %2566 }
 0x1bc   : > { %v1053_v35 = vsel %vm441_vm9, %v1052_v29, %v2483_v14  ;;  %v1060_v3 = vsel %vm441_vm9, %v1059_v36, %v2484_v62  ;;  %v2568_v29 = vunpack.i.l.bf16 %v2567_v55 }
 0x1bd   : > { %v4363_v51 = vsel %vm443_vm10, %v1053_v35, %v2533_v0  ;;  %v4366_v34 = vsel %vm443_vm10, %v1060_v3, %v2534_v23  ;;  %v1965_v5 = vsel %vm263_vm3, 0.0, %v1964_v33  ;;  %v2553_v0 = vunpack.i.l.bf16 %v4292_v6 }
 0x1bf   : > { %2711 = vrot.lane.b32.xlu1 %v2710_v30, %s2848_s19  ;;  %v4372_v7 = vpop.permute.xlu0 %2571 }
 0x1c0   : > { %v2574_v30 = vunpack.i.h.bf16 %v4372_v7  ;;  %v2573_v35 = vunpack.i.l.bf16 %v4372_v7  ;;  %v4837_v7 = vld [vmem:[#allocation40_spill] sm:$0xff] }
 0x1c1   : > { %2031 = vrot.lane.b32.xlu2 %v1961_v56, %s2847_s17  ;;  %v2569_v56 = vunpack.i.h.bf16 %v2567_v55 }
 0x1c2   : > { %2039 = vrot.lane.b32.xlu0 %v1963_v8, %s2849_s20 }
 0x1c3   : > { %v4422_v62 = vpop.permute.xlu1 %2581 }
 0x1c7   : > { %2716 = vrot.lane.b32.xlu1 %v2715_v54, %s2843_s8  ;;  %v4829_v54 = vld [vmem:[#allocation10_spill] sm:$0xff]  ;;  %v4406_v61 = vpop.permute.xlu0 %2586 }
 0x1c8   : > { %v4383_v57 = vpop.permute.xlu2 %2601  ;;  %v4831_v21 = vpack.i.bf16 %v4829_v54, %v4830_v16 }
 0x1c9   : > { %2706 = vrot.lane.b32.xlu2 %v2705_v41, %s2849_s20  ;;  %v4393_v41 = vsel %vm439_vm8, %v1661_v20, %v2548_v31  ;;  %v4836_v20 = vld [vmem:[#allocation36_spill] sm:$0xff]  ;;  %s2787_s20 = scalar_lea.hbm %s4705_s3, 32 }
 0x1ca   : > { %2071 = vrot.lane.b32.xlu0 %v2013_v1, %s2843_s8  ;;  %p2789_p1 = scmp.lt.s32.totalorder %s2787_s20, %s2783_s11 }
 0x1cc   : > { %p2790_p3 = por %p2789_p1, %p2788_p0 }
 0x1ce   : > { %p2791_p4 = pnand %p2790_p3, %p2786_p13 }
 0x1cf   : > { %2075 = vrot.lane.b32.xlu1 %v2021_v12, %s2848_s19 }
 0x1d0   : > { %v4408_v39 = vpop.permute.xlu2 %2063 }
 0x1d1   : > { %2721 = vrot.lane.b32.xlu2 %v4831_v21, %s2843_s8  ;;  %v4838_v21 = vld [vmem:[#allocation38_spill] sm:$0xff]  ;;  %s2200_s8 = sshll.u32 %s190_s7, 4  ;;  %s2201_s8 = int_to_ptr.vmem [resolvable:$true] %s2200_s8 }
 0x1d2   : > { %2047 = vrot.lane.b32.xlu0 %v1965_v5, %s2848_s19 }
 0x1d4   : > { %v4418_v47 = vpop.permute.xlu0 %2596 }
 0x1d8   : > { %v4420_v37 = vpop.permute.xlu2 %2616 }
 0x1d9   : > { %2726 = vrot.lane.b32.xlu2 %v2725_v40, %s2848_s19 }
 0x1da   : > { %2731 = vrot.lane.b32.xlu0 %v4834_v49, %s2848_s19 }
 0x1df   : > { %v4428_v44 = vpop.permute.xlu1 %2055 }
 0x1e0   : > { %v4424_v13 = vpop.permute.xlu2 %2043  ;;  %v4426_v10 = vpop.permute.xlu0 %2027 }
 0x1e8   : > { %v4432_v24 = vpop.permute.xlu0 %2611 }
 0x1e9   : > { %v4434_v22 = vpop.permute.xlu1 %2606 }
 0x1eb   : > { %v4430_v14 = vpop.permute.xlu2 %2631 }
 0x1f0   : > { %v2627_v23 = vpop.permute.xlu0 %2626 }
 0x1f1   : > { %v4436_v60 = vpop.permute.xlu1 %2035  ;;  %v2629_v28 = vunpack.i.h.bf16 %v2627_v23  ;;  %v2628_v31 = vunpack.i.l.bf16 %v2627_v23 }
 0x1f3   : > { %v2647_v40 = vpop.permute.xlu2 %2646 }
 0x1f4   : > { %v2649_v52 = vunpack.i.h.bf16 %v2647_v40  ;;  %v2648_v15 = vunpack.i.l.bf16 %v2647_v40 }
 0x1f8   : > { %v2642_v8 = vpop.permute.xlu0 %2641 }
 0x1f9   : > { %v2644_v3 = vunpack.i.h.bf16 %v2642_v8  ;;  %v2643_v1 = vunpack.i.l.bf16 %v2642_v8  ;;  %v2622_v59 = vpop.permute.xlu1 %2621 }
 0x1fa   : > { %v2624_v45 = vunpack.i.h.bf16 %v2622_v59  ;;  %v2623_v33 = vunpack.i.l.bf16 %v2622_v59 }
 0x1fb   : > { %v2667_v36 = vpop.permute.xlu2 %2666  ;;  %v865_v6 = vsel %vm431_vm4, %v4835_v9, %v2644_v3  ;;  %v858_v48 = vsel %vm431_vm4, %v4836_v20, %v2643_v1  ;;  %v2583_v1 = vunpack.i.l.bf16 %v4422_v62 }
 0x1fc   : > { %v859_v5 = vsel %vm433_vm5, %v858_v48, %v2568_v29  ;;  %v866_v54 = vsel %vm433_vm5, %v865_v6, %v2569_v56  ;;  %v659_v16 = vsel %vm431_vm4, %v4837_v7, %v2624_v45  ;;  %v652_v12 = vsel %vm431_vm4, %v4838_v21, %v2623_v33 }
 0x1fd   : > { %v653_v55 = vsel %vm433_vm5, %v652_v12, %v2553_v0  ;;  %v660_v17 = vsel %vm433_vm5, %v659_v16, %v2554_v18  ;;  %v860_v32 = vsel %vm435_vm6, %v859_v5, %v2648_v15  ;;  %v867_v49 = vsel %vm435_vm6, %v866_v54, %v2649_v52 }
 0x1fe   : > { %v4457_v40 = vsel %vm435_vm6, %v653_v55, %v2628_v31  ;;  %v4460_v23 = vsel %vm435_vm6, %v660_v17, %v2629_v28  ;;  %v861_v56 = vsel %vm437_vm7, %v860_v32, %v2573_v35  ;;  %v868_v29 = vsel %vm437_vm7, %v867_v49, %v2574_v30 }
 0x1ff   : > { %v2584_v18 = vunpack.i.h.bf16 %v4422_v62  ;;  %v2589_v15 = vunpack.i.h.bf16 %v4406_v61  ;;  %v2588_v45 = vunpack.i.l.bf16 %v4406_v61  ;;  %v2669_v30 = vunpack.i.h.bf16 %v2667_v36 }
 0x200   : > { %v2668_v31 = vunpack.i.l.bf16 %v2667_v36  ;;  %v2599_v17 = vunpack.i.h.bf16 %v4418_v47  ;;  %v2598_v32 = vunpack.i.l.bf16 %v4418_v47 }
 0x201   : > { %v4466_v0 = vpop.permute.xlu1 %2636 }
 0x203   : > { %v2682_v8 = vpop.permute.xlu2 %2681 }
 0x204   : > { %v4464_v3 = vpop.permute.xlu0 %2656  ;;  %v2684_v20 = vunpack.i.h.bf16 %v2682_v8  ;;  %v2683_v48 = vunpack.i.l.bf16 %v2682_v8 }
 0x206   : > { %v1872_v55 = vsel %vm431_vm4, %v4170_v4, %v2683_v48 }
 0x209   : > { %v2652_v28 = vpop.permute.xlu1 %2651 }
 0x20a   : > { %v2654_v9 = vunpack.i.h.bf16 %v2652_v28  ;;  %v2653_v6 = vunpack.i.l.bf16 %v2652_v28 }
 0x20b   : > { %v4470_v59 = vpop.permute.xlu2 %2051 }
 0x20c   : > { %v2662_v52 = vpop.permute.xlu0 %2661  ;;  %v4481_v61 = vsel %vm439_vm8, %v861_v56, %v2653_v6  ;;  %v4484_v16 = vsel %vm439_vm8, %v868_v29, %v2654_v9 }
 0x20d   : > { %v2664_v33 = vunpack.i.h.bf16 %v2662_v52  ;;  %v2663_v35 = vunpack.i.l.bf16 %v2662_v52  ;;  %v2608_v52 = vunpack.i.l.bf16 %v4434_v22 }
 0x20f   : > { %v1269_v5 = vsel %vm431_vm4, %v4097_v25, %v2664_v33  ;;  %v1262_v62 = vsel %vm431_vm4, %v4089_v26, %v2663_v35  ;;  %v1879_v26 = vsel %vm431_vm4, %v4183_v19, %v2684_v20  ;;  %v1873_v19 = vsel %vm433_vm5, %v1872_v55, %v2598_v32 }
 0x210   : > { %v1263_v54 = vsel %vm433_vm5, %v1262_v62, %v2583_v1  ;;  %v1270_v7 = vsel %vm433_vm5, %v1269_v5, %v2584_v18  ;;  %v2609_v1 = vunpack.i.h.bf16 %v4434_v22  ;;  %v2613_v55 = vunpack.i.l.bf16 %v4432_v24 }
 0x211   : > { %v1264_v36 = vsel %vm435_vm6, %v1263_v54, %v2668_v31  ;;  %v1271_v21 = vsel %vm435_vm6, %v1270_v7, %v2669_v30  ;;  %v4502_v18 = vpop.permute.xlu1 %2671  ;;  %v2558_v32 = vunpack.i.l.bf16 %v4370_v2 }
 0x212   : > { %v4489_v12 = vsel %vm437_vm7, %v1264_v36, %v2588_v45  ;;  %v4492_v25 = vsel %vm437_vm7, %v1271_v21, %v2589_v15  ;;  %v1880_v15 = vsel %vm433_vm5, %v1879_v26, %v2599_v17  ;;  %v2564_v36 = vunpack.i.h.bf16 %v4355_v42 }
 0x213   : > { %v2692_v49 = vpop.permute.xlu2 %2691 }
 0x214   : > { %v4500_v56 = vpop.permute.xlu0 %2676  ;;  %v2694_v29 = vunpack.i.h.bf16 %v2692_v49  ;;  %v2693_v8 = vunpack.i.l.bf16 %v2692_v49 }
 0x216   : > { %v1874_v4 = vsel %vm435_vm6, %v1873_v19, %v2693_v8  ;;  %v1881_v45 = vsel %vm435_vm6, %v1880_v15, %v2694_v29  ;;  %v2634_v8 = vunpack.i.h.bf16 %v4430_v14  ;;  %v2563_v19 = vunpack.i.l.bf16 %v4355_v42 }
 0x217   : > { %v1875_v47 = vsel %vm437_vm7, %v1874_v4, %v2608_v52  ;;  %v1882_v33 = vsel %vm437_vm7, %v1881_v45, %v2609_v1  ;;  %v2633_v1 = vunpack.i.l.bf16 %v4430_v14  ;;  %v655_v15 = vsel %vm437_vm7, %v4457_v40, %v2558_v32 }
 0x218   : > { %v2638_v45 = vunpack.i.l.bf16 %v4466_v0  ;;  %v2578_v40 = vunpack.i.l.bf16 %v4322_v58  ;;  %v2579_v32 = vunpack.i.h.bf16 %v4322_v58  ;;  %v2101_v58 = vrot.slane %v4366_v34, 4 }
 0x219   : > { %v2024_v28 = vpop.permute.xlu1 %2023  ;;  %v656_v14 = vsel %vm439_vm8, %v655_v15, %v2633_v1 }
 0x21a   : > { %v2078_v31 = vsel %vm431_vm4, %v4238_v27, %v2024_v28  ;;  %v2604_v27 = vunpack.i.h.bf16 %v4383_v57  ;;  %v2639_v28 = vunpack.i.h.bf16 %v4466_v0  ;;  %v657_v42 = vsel %vm441_vm9, %v656_v14, %v2563_v19 }
 0x21b   : > { %v2032_v30 = vpop.permute.xlu2 %2031  ;;  %v2079_v22 = vsel %vm433_vm5, %v2078_v31, %v4426_v10  ;;  %v2603_v10 = vunpack.i.l.bf16 %v4383_v57 }
 0x21c   : > { %v2687_v35 = vpop.permute.xlu0 %2686  ;;  %v2080_v20 = vsel %vm435_vm6, %v2079_v22, %v2032_v30  ;;  %v2674_v30 = vunpack.i.h.bf16 %v4502_v18 }
 0x21d   : > { %v2689_v9 = vunpack.i.h.bf16 %v2687_v35  ;;  %v2688_v6 = vunpack.i.l.bf16 %v2687_v35  ;;  %v4519_v48 = vsel %vm437_vm7, %v2080_v20, %v4436_v60  ;;  %v2614_v60 = vunpack.i.h.bf16 %v4432_v24 }
 0x21e   : > { %v2593_v20 = vunpack.i.l.bf16 %v4360_v63 }
 0x21f   : > { %v1475_v5 = vsel %vm431_vm4, %v4199_v43, %v2689_v9  ;;  %v1468_v62 = vsel %vm431_vm4, %v4195_v38, %v2688_v6  ;;  %v2559_v38 = vunpack.i.h.bf16 %v4370_v2  ;;  %v2673_v2 = vunpack.i.l.bf16 %v4502_v18 }
 0x220   : > { %v1469_v43 = vsel %vm433_vm5, %v1468_v62, %v2603_v10  ;;  %v1476_v17 = vsel %vm433_vm5, %v1475_v5, %v2604_v27  ;;  %v2619_v5 = vunpack.i.h.bf16 %v4420_v37  ;;  %v2618_v62 = vunpack.i.l.bf16 %v4420_v37 }
 0x221   : > { %v2697_v7 = vpop.permute.xlu1 %2696  ;;  %v662_v4 = vsel %vm437_vm7, %v4460_v23, %v2559_v38  ;;  %v1266_v0 = vsel %vm439_vm8, %v4489_v12, %v2673_v2  ;;  %v658_v10 = vsel %vm443_vm10, %v657_v42, %v2638_v45  ;;  %v2594_v37 = vunpack.i.h.bf16 %v4360_v63 }
 0x222   : > { %v2699_v21 = vunpack.i.h.bf16 %v2697_v7  ;;  %v2698_v26 = vunpack.i.l.bf16 %v2697_v7  ;;  %v663_v35 = vsel %vm439_vm8, %v662_v4, %v2634_v8  ;;  %v1273_v7 = vsel %vm439_vm8, %v4492_v25, %v2674_v30 }
 0x223   : > { %v4536_v49 = vpop.permute.xlu2 %2706  ;;  %v664_v22 = vsel %vm441_vm9, %v663_v35, %v2564_v36  ;;  %v2100_v63 = vrot.slane %v4363_v51, 4  ;;  %v2659_v8 = vunpack.i.h.bf16 %v4464_v3 }
 0x224   : > { %v4525_v54 = vpop.permute.xlu0 %2059  ;;  %v1470_v57 = vsel %vm435_vm6, %v1469_v43, %v2698_v26  ;;  %v1477_v29 = vsel %vm435_vm6, %v1476_v17, %v2699_v21  ;;  %v2094_v21 = vrot.slane %v658_v10, 4  ;;  %v665_v26 = vsel %vm443_vm10, %v664_v22, %v2639_v28 }
 0x225   : > { %v4543_v24 = vsel %vm437_vm7, %v1470_v57, %v2613_v55  ;;  %v4546_v52 = vsel %vm437_vm7, %v1477_v29, %v2614_v60  ;;  %v2658_v60 = vunpack.i.l.bf16 %v4464_v3  ;;  %v1274_v43 = vsel %vm441_vm9, %v1273_v7, %v2594_v37  ;;  %v2126_v3 = vld [vmem:[%s4704_s2] sm:$0xff] }
 0x226   : > { %v4588_v25 = vsel %vm2116_vm11, %v4317_v11, %v2094_v21  ;;  %v863_v17 = vsel %vm441_vm9, %v4481_v61, %v2578_v40  ;;  %v2709_v34 = vunpack.i.h.bf16 %v4536_v49  ;;  %v2708_v4 = vunpack.i.l.bf16 %v4536_v49 }
 0x227   : > { %v864_v29 = vsel %vm443_vm10, %v863_v17, %v2658_v60  ;;  %v2679_v40 = vunpack.i.h.bf16 %v4500_v56 }
 0x228   : > { %v4604_v19 = vsel %vm2116_vm11, %v864_v29, %v2100_v63  ;;  %v1472_v42 = vsel %vm439_vm8, %v4543_v24, %v2708_v4 }
 0x229   : > { %v4562_v23 = vpop.permute.xlu1 %2067 }
 0x22b   : > { %v4584_v55 = vpop.permute.xlu2 %2721 }
 0x22c   : > { %v2702_v31 = vpop.permute.xlu0 %2701  ;;  %v2723_v37 = vunpack.i.l.bf16 %v4584_v55 }
 0x22d   : > { %v2704_v9 = vunpack.i.h.bf16 %v2702_v31  ;;  %v2703_v6 = vunpack.i.l.bf16 %v2702_v31 }
 0x22e   : > { %v1663_v63 = vsel %vm441_vm9, %v4393_v41, %v2723_v37  ;;  %v2125_v41 = vld [vmem:[%s4703_s1] sm:$0xff] }
 0x22f   : > { %v1876_v18 = vsel %vm439_vm8, %v1875_v47, %v2703_v6  ;;  %v1883_v27 = vsel %vm439_vm8, %v1882_v33, %v2704_v9  ;;  %v1267_v47 = vsel %vm441_vm9, %v1266_v0, %v2593_v20  ;;  %v2095_v33 = vrot.slane %v665_v26, 4 }
 0x230   : > { %v4575_v36 = vsel %vm441_vm9, %v1876_v18, %v2618_v62  ;;  %v4580_v12 = vsel %vm441_vm9, %v1883_v27, %v2619_v5 }
 0x231   : > { %v4596_v38 = vsel %vm2116_vm11, %v4320_v50, %v2095_v33  ;;  %v2712_v1 = vpop.permute.xlu1 %2711  ;;  %v870_v50 = vsel %vm441_vm9, %v4484_v16, %v2579_v32 }
 0x232   : > { %v871_v61 = vsel %vm443_vm10, %v870_v50, %v2659_v8  ;;  %v2714_v21 = vunpack.i.h.bf16 %v2712_v1  ;;  %v2713_v26 = vunpack.i.l.bf16 %v2712_v1 }
 0x233   : > { %v2120_v2 = vsel %vm2116_vm11, %v871_v61, %v2101_v58  ;;  %v2727_v15 = vpop.permute.xlu2 %2726 }
 0x234   : > { %v2040_v57 = vpop.permute.xlu0 %2039  ;;  %v2729_v30 = vunpack.i.h.bf16 %v2727_v15  ;;  %v2728_v31 = vunpack.i.l.bf16 %v2727_v15  ;;  %v1885_v33 = vsel %vm443_vm10, %v4580_v12, %v2714_v21 }
 0x235   : > { %v2082_v11 = vsel %vm439_vm8, %v4519_v48, %v2040_v57  ;;  %v2850_v48 = vmov 0   ;;  %v2113_v29 = vrot.slane %v1885_v33, 4 }
 0x236   : > { %v2083_v51 = vsel %vm441_vm9, %v2082_v11, %v4424_v13  ;;  %2735 = vset.pattern.permute.xlu1 %v2850_v48  ;;  %2736 = vset.pattern.permute.xlu0 %v2850_v48  ;;  %v2085_v13 = vsel %vm431_vm4, %v4278_v46, %v4470_v59  ;;  %v1479_v46 = vsel %vm439_vm8, %v4546_v52, %v2709_v34 }
 0x237   : > { %2129 = vperm.xlu1 %2735, %v2126_v3   ;;  %v2086_v14 = vsel %vm433_vm5, %v2085_v13, %v4428_v44  ;;  %v2678_v44 = vunpack.i.l.bf16 %v4500_v56 }
 0x238   : > { %v2087_v59 = vsel %vm435_vm6, %v2086_v14, %v4525_v54  ;;  %v1275_v54 = vsel %vm443_vm10, %v1274_v43, %v2679_v40 }
 0x239   : > { %v2717_v45 = vpop.permute.xlu1 %2716  ;;  %v2088_v52 = vsel %vm437_vm7, %v2087_v59, %v4408_v39  ;;  %v1268_v5 = vsel %vm443_vm10, %v1267_v47, %v2678_v44  ;;  %v1878_v47 = vsel %vm443_vm10, %v4575_v36, %v2713_v26 }
 0x23a   : > { %v2719_v35 = vunpack.i.h.bf16 %v2717_v45  ;;  %v2718_v28 = vunpack.i.l.bf16 %v2717_v45  ;;  %v2089_v62 = vsel %vm439_vm8, %v2088_v52, %v4562_v23  ;;  %v2724_v23 = vunpack.i.h.bf16 %v4584_v55 }
 0x23b   : > { %v2112_v32 = vrot.slane %v1878_v47, 4 }
 0x23c   : > { %v2072_v16 = vpop.permute.xlu0 %2071  ;;  %v1473_v22 = vsel %vm441_vm9, %v1472_v42, %v2718_v28  ;;  %v1480_v49 = vsel %vm441_vm9, %v1479_v46, %v2719_v35  ;;  %v1670_v57 = vsel %vm441_vm9, %v4396_v53, %v2724_v23 }
 0x23d   : > { %v1474_v9 = vsel %vm443_vm10, %v1473_v22, %v2728_v31  ;;  %v1481_v6 = vsel %vm443_vm10, %v1480_v49, %v2729_v30  ;;  %v2090_v27 = vsel %vm441_vm9, %v2089_v62, %v2072_v16 }
 0x23e   : > { %v2106_v20 = vrot.slane %v1474_v9, 4  ;;  %v2107_v24 = vrot.slane %v1481_v6, 4 }
 0x240   : > { %v2121_v18 = vsel %vm2116_vm11, %v1268_v5, %v2106_v20  ;;  %v2122_v56 = vsel %vm2116_vm11, %v1275_v54, %v2107_v24 }
 0x241   : > { %v2076_v10 = vpop.permute.xlu1 %2075 }
 0x242   : > { %v2091_v39 = vsel %vm443_vm10, %v2090_v27, %v2076_v10 }
 0x243   : > { %2284 = vmatpush.msk.msra.mxu1 %vm2116_vm11, %v2091_v39 }
 0x244   : > { %v2048_v0 = vpop.permute.xlu0 %2047 }
 0x245   : > { %v2084_v7 = vsel %vm443_vm10, %v2083_v51, %v2048_v0 }
 0x246   : > { %2282 = vmatpush.msk.msra.mxu0 %vm2116_vm11, %v2084_v7 }
 0x24c   : > { %v2732_v60 = vpop.permute.xlu0 %2731 }
 0x24d   : > { %v2734_v43 = vunpack.i.h.bf16 %v2732_v60  ;;  %v2733_v17 = vunpack.i.l.bf16 %v2732_v60 }
 0x24f   : > { %v1664_v8 = vsel %vm443_vm10, %v1663_v63, %v2733_v17  ;;  %v1671_v55 = vsel %vm443_vm10, %v1670_v57, %v2734_v43 }
 0x250   : > { %v2123_v36 = vsel %vm2116_vm11, %v1664_v8, %v2112_v32  ;;  %v2124_v12 = vsel %vm2116_vm11, %v1671_v55, %v2113_v29 }
 0x251   : > { %2154 = vmatpush.msra.mxu0 %v2123_v36  ;;  %2174 = vmatpush.msra.mxu1 %v2124_v12 }
 0x253   : > { %2155 = vmatpush.msra.mxu0 %v2121_v18  ;;  %2175 = vmatpush.msra.mxu1 %v2122_v56 }
 0x255   : > { %2156 = vmatpush.msra.mxu0 %v4604_v19  ;;  %2176 = vmatpush.msra.mxu1 %v2120_v2 }
 0x257   : > { %2157 = vmatpush.msra.mxu0 %v4588_v25  ;;  %2177 = vmatpush.msra.mxu1 %v4596_v38 }
 0x258   : > { %2283 = vmatmul.msk.f32.vlgmr.msra.gmra.mxu0 %vm2132_vm12, %v2125_v41  ;;  %2285 = vmatmul.msk.f32.vlgmr.msra.gmra.mxu1 %vm2132_vm12, %v2125_v41 }
 0x2a9   : > { %v2130_v53 = vpop.permute.xlu1 %2129 }
 0x2d5   : > { %v2159_v11 = vpop.f32.mrf.mxu0  ;;  %v2179_v1 = vpop.f32.mrf.mxu1 }
 0x2d6   : > { %v2160_v19 = vadd.f32 %v2159_v11, %v2130_v53  ;;  %v2180_v51 = vadd.f32 %v2179_v1, %v2130_v53 }
 0x2d8   : > { %v2182_v25 = vmax.f32 %v2160_v19, 0.0  ;;  %v2183_v38 = vmax.f32 %v2180_v51, 0.0 }
 0x2da   : > { %2184 = vst [vmem:[%s190_s7] sm:$0xff] %v2182_v25 }
 0x2db   : > { %2185 = vst [vmem:[%s190_s7 + $0x8] sm:$0xff] %v2183_v38 }
 0x2dc   : > { %2794 = shalt.err (!%p2791_p4)
}
 0x2dd   : > { %2295 = dma.vmem_to_hbm [thread:$0]  (%p2921_p11), %s2201_s8, 256, %s2203_s9, %s2187_s16  }
 0x2de PF: > { %s2214_s29 = sand.u32 1, %s2821_s12   ;;  %p4839_p7 = scmp.ge.s32.totalorder %s2833_s15, 2 }
 0x2df   : > { %s2215_s26 = scalar_lea.sflag [#allocation5], %s2214_s29 }
 0x2e0   : > { %p2302_p5 = pnand %p4839_p7, %p2925_p12 }
 0x2e2   : > { %p2303_p8 = pneg %p2302_p5 }
 0x2e4   : > { %2816 = dma.done.wait (%p2303_p8), %s2215_s26, 256  }
 0x2e5   : > { %2818 = vsyncadd (%p2303_p8), %s2215_s26, 4294967040  ;;  %p16_p10 = scmp.ge.s32.totalorder %s2896_s18, 4   ;;  %s4840_s12 = smov %s2825_s13 }
 0x2e6   : > { %s4841_s13 = smov %s2829_s14  ;;  %s4842_s14 = smov %s2908_s21 }
 0x2e7   : > { %s4843_s15 = smov %s2896_s18  ;;  %18 = sbr.rel (!%p16_p10) target bundleno = 5 (0x5), region = 77 }
 0x2ec   :  { %2221 = vsyncpa [#allocation4], 1 }
 0x2ed   :  { %2223 = vsyncpa [#allocation4 + $0x1], 1 }
 0x2ee   :  { %2224 = vsyncpa [#allocation5], 1 }
 0x2ef   :  { %2226 = vsyncpa [#allocation5 + $0x1], 1 }

</bundles_post_ra>
